<compile_context>
chip_gen: v7x
topology: tpu7x:2x2x1
jax: 0.10.0
libtpu: 0.0.40
codegen_flags: <defaults>
</compile_context>

<pallas_src>
import functools
import math

import jax
import jax.numpy as jnp
from jax.experimental import pallas as pl
from jax.experimental.pallas import tpu as pltpu

EPS = 1e-5
LANES = 128
VMEM_LIMIT = 40 * 1024 * 1024          # safe on v5e/v6e (128 MiB) and v7x (64 MiB)
GEMM_VMEM_BUDGET = 24 * 1024 * 1024    # working budget used to derive tile sizes
TM_MAX = 2048                          # upper bound on the GEMM M tile


def _round_up(x, m):
    return ((x + m - 1) // m) * m


def _cdiv(a, b):
    return (a + b - 1) // b


# ----------------------------------------------------------------------------
# Lane-dense store probe: fold Cout<128 outputs into 128-wide rows in-kernel.
# ----------------------------------------------------------------------------
def _fold_probe_kernel(x_ref, o_ref, *, fold):
    m, n = x_ref.shape
    o_ref[...] = x_ref[...].reshape(m // fold, n * fold)


@functools.lru_cache(maxsize=None)
def _fold_reshape_supported():
    """Probe whether Mosaic supports the sublane->lane folding reshape used for
    lane-dense stores of Cout=32/64 layers; fall back to masked stores if not."""
    try:
        for n_out in (32, 64):
            fold = LANES // n_out
            f = pl.pallas_call(
                functools.partial(_fold_probe_kernel, fold=fold),
                out_shape=jax.ShapeDtypeStruct((256 // fold, LANES), jnp.float32),
                grid=(1,),
                in_specs=[pl.BlockSpec((256, n_out), lambda i: (0, 0))],
                out_specs=pl.BlockSpec((256 // fold, LANES), lambda i: (0, 0)),
            )
            x = jnp.zeros((256, n_out), jnp.float32)
            jax.jit(f).lower(x).compile()
        return True
    except Exception:
        return False


def _fold_for(n_out):
    if n_out in (32, 64) and _fold_reshape_supported():
        return LANES // n_out
    return 1


# ----------------------------------------------------------------------------
# Pallas kernel 1: fused GEMM + bias (folded BN) + optional ReLU + residual
# (used by every Conv2d via explicit im2col patches)
# ----------------------------------------------------------------------------
def _gemm_kernel(x_ref, w_ref, b_ref, *rest, relu, n_out, fold, has_res):
    if has_res:
        res_ref, o_ref = rest
    else:
        (o_ref,) = rest
    # bf16 x bf16 -> f32 on the MXU, single K step (full K resident in VMEM).
    y = jnp.dot(x_ref[...], w_ref[...], preferred_element_type=jnp.float32)
    y = y + b_ref[...]
    if relu:
        y = jnp.maximum(y, 0.0)
    if n_out < LANES:
        y = y[:, :n_out]
    if has_res:
        y = y + res_ref[...].astype(jnp.float32)
    if fold > 1:                       # lane-dense store for Cout<128
        y = y.reshape(y.shape[0] // fold, n_out * fold)
    o_ref[...] = y.astype(o_ref.dtype)


@functools.lru_cache(maxsize=None)
def _gemm_call(Mp, K, tm, n_out, relu, has_res, fold, out_dtype_name):
    out_dtype = jnp.dtype(out_dtype_name)
    grid = (Mp // tm,)
    kernel = functools.partial(_gemm_kernel, relu=relu, n_out=n_out,
                               fold=fold, has_res=has_res)
    in_specs = [
        pl.BlockSpec((tm, K), lambda i: (i, 0)),        # activations / patches
        pl.BlockSpec((K, LANES), lambda i: (0, 0)),     # weight (full K resident)
        pl.BlockSpec((1, LANES), lambda i: (0, 0)),     # bias (folded BN)
    ]
    if has_res:
        in_specs.append(pl.BlockSpec((tm, n_out), lambda i: (i, 0)))
    if fold > 1:
        out_spec = pl.BlockSpec((tm // fold, LANES), lambda i: (i, 0))
        out_shape = jax.ShapeDtypeStruct((Mp // fold, LANES), out_dtype)
    else:
        out_spec = pl.BlockSpec((tm, n_out), lambda i: (i, 0))
        out_shape = jax.ShapeDtypeStruct((Mp, n_out), out_dtype)
    return pl.pallas_call(
        kernel,
        out_shape=out_shape,
        grid_spec=pltpu.PrefetchScalarGridSpec(
            num_scalar_prefetch=0, grid=grid,
            in_specs=in_specs, out_specs=out_spec),
        compiler_params=pltpu.CompilerParams(
            dimension_semantics=("parallel",),
            vmem_limit_bytes=VMEM_LIMIT))


def _pick_tm(M, K, n_out):
    # per-step VMEM: double-buffered bf16 activations + out blocks + f32 accum,
    # plus the resident weight; keep under GEMM_VMEM_BUDGET.
    bytes_per_row = 4 * K + 4 * LANES + 4 * LANES + 4 * n_out
    cap = max(128, (GEMM_VMEM_BUDGET - 4 * K * LANES) // max(bytes_per_row, 1))
    tm = min(TM_MAX, cap, _round_up(M, 128))
    tm = max(128, (tm // 128) * 128)
    # keep >= 2 M-steps when possible so the parallel axis can shard across cores
    if M > 256 and _round_up(M, tm) // tm < 2:
        tm = max(128, _round_up(_cdiv(M, 2), 128))
    return tm


def pallas_gemm(x, w, b, n_out, relu, residual=None, out_dtype=jnp.bfloat16):
    """(M,K)@(K,128)+b [+residual] with optional ReLU fused in one Pallas kernel."""
    M, K = x.shape
    assert w.shape == (K, LANES)
    tm = _pick_tm(M, K, n_out)
    Mp = _round_up(M, tm)
    xp = x.astype(jnp.bfloat16)
    if Mp != M:
        xp = jnp.pad(xp, ((0, Mp - M), (0, 0)))
    fold = _fold_for(n_out)
    args = [xp, w, b]
    if residual is not None:
        r = residual.astype(out_dtype)
        if Mp != M:
            r = jnp.pad(r, ((0, Mp - M), (0, 0)))
        args.append(r)
    out = _gemm_call(Mp, K, tm, int(n_out), bool(relu), residual is not None,
                     fold, jnp.dtype(out_dtype).name)(*args)
    if fold > 1:
        out = out.reshape(Mp, n_out)
    return out[:M] if Mp != M else out


# ----------------------------------------------------------------------------
# Pallas kernel 2: implicit-im2col 3x3x3 Conv3d (+BN +ReLU +residual), stride 1 pad 1
# ----------------------------------------------------------------------------
def _conv3d_kernel(x00, x01, x10, x11, x20, x21, w_ref, b_ref, *rest,
                   G, W, Wp, C, n_out, relu, has_res, fold):
    if has_res:
        res_ref, o_ref, xd, patch = rest
    else:
        o_ref, xd, patch = rest
    bands = ((x00, x01), (x10, x11), (x20, x21))
    M = G * W
    # Build the 27-tap patch matrix in VMEM (never materialized in HBM).
    for dz in range(3):
        xd[:G] = bands[dz][0][0, 0]          # (G, Wp, C) band b
        xd[G:] = bands[dz][1][0, 0]          # (G, Wp, C) band b+1
        for dy in range(3):
            for dx in range(3):
                t = (dz * 3 + dy) * 3 + dx
                win = xd[dy:dy + G, dx:dx + W, :]          # (G, W, C)
                patch[:, t * C:(t + 1) * C] = win.reshape(M, C)
    y = jnp.dot(patch[...], w_ref[...], preferred_element_type=jnp.float32)
    y = y + b_ref[...]
    if relu:
        y = jnp.maximum(y, 0.0)
    if n_out < LANES:
        y = y[:, :n_out]
    if has_res:
        y = y + res_ref[...].astype(jnp.float32)
    if fold > 1:
        y = y.reshape(M // fold, n_out * fold)
    o_ref[...] = y.astype(o_ref.dtype)


@functools.lru_cache(maxsize=None)
def _conv3d_call(N, D, H, W, C, G, n_out, relu, has_res, fold, out_dtype_name):
    out_dtype = jnp.dtype(out_dtype_name)
    Wp = W + 2
    bands = H // G
    M = N * D * H * W
    MB = G * W                                  # output rows per grid step
    grid = (N, D, bands)

    def make_x_spec(dz, half):
        def idx(n, d, b):
            return (n, d + dz, b + half, 0, 0)
        return pl.BlockSpec((1, 1, G, Wp, C), idx)

    def const_idx(n, d, b):
        return (0, 0)

    def out_idx(n, d, b):
        return ((n * D + d) * bands + b, 0)

    in_specs = [make_x_spec(dz, h) for dz in range(3) for h in range(2)]
    in_specs += [pl.BlockSpec((27 * C, LANES), const_idx),
                 pl.BlockSpec((1, LANES), const_idx)]
    if has_res:
        in_specs.append(pl.BlockSpec((MB, n_out), out_idx))
    if fold > 1:
        out_spec = pl.BlockSpec((MB // fold, LANES), out_idx)
        out_shape = jax.ShapeDtypeStruct((M // fold, LANES), out_dtype)
    else:
        out_spec = pl.BlockSpec((MB, n_out), out_idx)
        out_shape = jax.ShapeDtypeStruct((M, n_out), out_dtype)

    kernel = functools.partial(_conv3d_kernel, G=G, W=W, Wp=Wp, C=C,
                               n_out=n_out, relu=relu, has_res=has_res, fold=fold)
    return pl.pallas_call(
        kernel,
        out_shape=out_shape,
        grid_spec=pltpu.PrefetchScalarGridSpec(
            num_scalar_prefetch=0, grid=grid,
            in_specs=in_specs, out_specs=out_spec,
            scratch_shapes=[pltpu.VMEM((2 * G, Wp, C), jnp.bfloat16),
                            pltpu.VMEM((MB, 27 * C), jnp.bfloat16)]),
        compiler_params=pltpu.CompilerParams(
            dimension_semantics=("parallel", "parallel", "parallel"),
            vmem_limit_bytes=VMEM_LIMIT))


def _pick_g(H, W, C):
    """Pick the H band size for the implicit Conv3d kernel (divisor of H)."""
    target_rows = 4096 if C <= 32 else 2048
    best = 2
    for g in range(2, H + 1):
        if H % g:
            continue
        est = (6 * 2 * g * (W + 2) * C * 2 + 2 * g * (W + 2) * C * 2
               + g * W * 27 * C * 2 + g * W * LANES * 4
               + 2 * g * W * LANES * 2 + 2 * 27 * C * LANES * 2)
        if est > GEMM_VMEM_BUDGET:
            break
        best = g
        if g * W >= target_rows:
            break
    return best


@functools.partial(jax.jit, static_argnames=("relu", "n_out", "out_dtype"))
def conv3d_gemm(x, w, b, residual=None, *, relu, n_out, out_dtype=jnp.bfloat16):
    """3x3x3 conv, stride 1, pad 1 (the only Conv3d config in PSMNet)."""
    N, D, H, W, C = x.shape
    assert H % 2 == 0 and w.shape[0] == 27 * C
    G = _pick_g(H, W, C)
    # zero-pad D/H/W by 1 (H additionally rounded up to a whole extra band)
    xp = jnp.pad(x.astype(jnp.bfloat16),
                 ((0, 0), (1, 1), (1, G - 1), (1, 1), (0, 0)))
    M = N * D * H * W
    fold = _fold_for(n_out)
    if fold > 1 and (G * W) % fold != 0:
        fold = 1
    args = [xp] * 6 + [w, b]
    if residual is not None:
        args.append(residual.reshape(M, n_out).astype(out_dtype))
    out = _conv3d_call(N, D, H, W, C, G, int(n_out), bool(relu),
                       residual is not None, fold,
                       jnp.dtype(out_dtype).name)(*args)
    if fold > 1:
        out = out.reshape(M, n_out)
    return out.reshape(N, D, H, W, n_out)


# ----------------------------------------------------------------------------
# Pallas kernel 3: fused softmax over disparity + disparity regression
# ----------------------------------------------------------------------------
def _softmax_dispreg_kernel(x_ref, o_ref):
    x = x_ref[...].astype(jnp.float32)               # (1, D, TW)
    m = jnp.max(x, axis=1, keepdims=True)
    e = jnp.exp(x - m)
    s = jnp.sum(e, axis=1, keepdims=True)
    p = e * pl.reciprocal(s, approx=False)           # exact (avoids disparity bias)
    disp = jax.lax.broadcasted_iota(jnp.float32, x.shape, 1)
    o_ref[...] = jnp.sum(p * disp, axis=1)           # (1, TW)


@functools.lru_cache(maxsize=None)
def _softmax_dispreg_call(N, D, HW, TW):
    return pl.pallas_call(
        _softmax_dispreg_kernel,
        out_shape=jax.ShapeDtypeStruct((N, HW), jnp.float32),
        grid_spec=pltpu.PrefetchScalarGridSpec(
            num_scalar_prefetch=0,
            grid=(N, HW // TW),
            in_specs=[pl.BlockSpec((1, D, TW), lambda n, t: (n, 0, t))],
            out_specs=pl.BlockSpec((1, TW), lambda n, t: (n, t)),
        ),
        compiler_params=pltpu.CompilerParams(
            dimension_semantics=("parallel", "parallel"),
            vmem_limit_bytes=VMEM_LIMIT))


@jax.jit
def softmax_disparity_regression(cost):
    """cost: (N, maxdisp, H, W) f32 -> pred (N, H, W)."""
    N, D, H, W = cost.shape
    HW = H * W
    TW = 128
    while TW < 8192 and HW % (TW * 2) == 0:
        TW *= 2
    assert HW % TW == 0, "H*W must be a multiple of 128"
    out = _softmax_dispreg_call(N, D, HW, TW)(
        cost.reshape(N, D, HW).astype(jnp.float32))
    return out.reshape(N, H, W)


# ----------------------------------------------------------------------------
# Conv2d wrapper: im2col glue + fused Pallas GEMM, jitted per config/shape
# ----------------------------------------------------------------------------
@functools.partial(jax.jit, static_argnames=("k", "stride", "pad", "dilation",
                                             "relu", "n_out"))
def conv2d_gemm(x, w, b, residual=None, *, k, stride, pad, dilation, relu, n_out):
    N, H, W, C = x.shape
    x = x.astype(jnp.bfloat16)
    if pad:
        x = jnp.pad(x, ((0, 0), (pad, pad), (pad, pad), (0, 0)))
    eff = dilation * (k - 1) + 1
    Ho = (H + 2 * pad - eff) // stride + 1
    Wo = (W + 2 * pad - eff) // stride + 1
    if k == 1 and stride == 1:
        patches = x
    else:
        cols = []
        for i in range(k):
            for j in range(k):
                cols.append(
                    x[:,
                      i * dilation:i * dilation + (Ho - 1) * stride + 1:stride,
                      j * dilation:j * dilation + (Wo - 1) * stride + 1:stride,
                      :])
        patches = jnp.concatenate(cols, axis=-1) if len(cols) > 1 else cols[0]
    K = k * k * C
    Kp = w.shape[0]
    p2 = patches.reshape(N * Ho * Wo, K)
    if Kp != K:
        p2 = jnp.pad(p2, ((0, 0), (0, Kp - K)))
    res2 = None if residual is None else residual.reshape(N * Ho * Wo, n_out)
    y = pallas_gemm(p2, w, b, n_out, relu, residual=res2)
    return y.reshape(N, Ho, Wo, n_out)


def convbn2d_fwd(x, p, *, k, stride, pad, dilation, relu, residual=None):
    return conv2d_gemm(x, p['w'], p['b'], residual, k=k, stride=stride, pad=pad,
                       dilation=dilation, relu=relu, n_out=p['n_out'])


def convbn3d_fwd(x, p, *, relu, residual=None, out_dtype=jnp.bfloat16):
    return conv3d_gemm(x, p['w'], p['b'], residual, relu=relu,
                       n_out=p['n_out'], out_dtype=out_dtype)


# ----------------------------------------------------------------------------
# Deterministic parameter construction (mirrors module __init__)
# Weights are BN-folded, repacked to (K,128), cast to bf16 once here.
# ----------------------------------------------------------------------------
class KeyGen:
    def __init__(self, seed):
        self._key = jax.random.PRNGKey(seed)

    def __call__(self):
        self._key, sub = jax.random.split(self._key)
        return sub


def _pack_gemm_params(w, b, cout):
    K, N = w.shape
    assert N <= LANES
    Kp = _round_up(K, 16)
    w = jnp.pad(w, ((0, Kp - K), (0, LANES - N))).astype(jnp.bfloat16)
    b = jnp.pad(b, ((0, LANES - N),)).astype(jnp.float32).reshape(1, LANES)
    return {'w': w, 'b': b, 'n_out': int(cout)}


def _conv2d_weight(kg, cin, cout, k):
    std = math.sqrt(2.0 / (k * k * cout))
    w = std * jax.random.normal(kg(), (cout, cin, k, k), jnp.float32)
    return jnp.transpose(w, (2, 3, 1, 0)).reshape(k * k * cin, cout)


def _conv3d_weight(kg, cin, cout, k):
    std = math.sqrt(2.0 / (k * k * k * cout))
    w = std * jax.random.normal(kg(), (cout, cin, k, k, k), jnp.float32)
    return jnp.transpose(w, (2, 3, 4, 1, 0)).reshape(k * k * k * cin, cout)


def _fold_bn(w, cout):
    gamma = jnp.ones((cout,), jnp.float32)
    beta = jnp.zeros((cout,), jnp.float32)
    mean = jnp.zeros((cout,), jnp.float32)
    var = jnp.ones((cout,), jnp.float32)
    scale = gamma / jnp.sqrt(var + EPS)
    return w * scale[None, :], beta - mean * scale


def make_convbn2d(kg, cin, cout, k):
    w, b = _fold_bn(_conv2d_weight(kg, cin, cout, k), cout)
    return _pack_gemm_params(w, b, cout)


def make_conv2d(kg, cin, cout, k):
    return _pack_gemm_params(_conv2d_weight(kg, cin, cout, k),
                             jnp.zeros((cout,), jnp.float32), cout)


def make_convbn3d(kg, cin, cout, k=3):
    w, b = _fold_bn(_conv3d_weight(kg, cin, cout, k), cout)
    return _pack_gemm_params(w, b, cout)


def make_conv3d(kg, cin, cout, k=3):
    return _pack_gemm_params(_conv3d_weight(kg, cin, cout, k),
                             jnp.zeros((cout,), jnp.float32), cout)


def make_spp_branches(kg, cin, cout):
    """Four 1x1 convbn branches stacked along N into one 128->128 GEMM."""
    ws, bs = [], []
    for _ in range(4):
        w, b = _fold_bn(_conv2d_weight(kg, cin, cout, 1), cout)
        ws.append(w)
        bs.append(b)
    return _pack_gemm_params(jnp.concatenate(ws, axis=1),
                             jnp.concatenate(bs, axis=0), 4 * cout)


def make_basic_block(kg, inplanes, planes, stride, dilation, with_downsample):
    return {'conv1': make_convbn2d(kg, inplanes, planes, 3),
            'conv2': make_convbn2d(kg, planes, planes, 3),
            'downsample': make_convbn2d(kg, inplanes, planes, 1)
            if with_downsample else None,
            'stride': stride, 'dilation': dilation}


def make_layer(kg, inplanes, planes, blocks, stride, dilation):
    layer = [make_basic_block(kg, inplanes, planes, stride, dilation,
                              stride != 1 or inplanes != planes)]
    for _ in range(1, blocks):
        layer.append(make_basic_block(kg, planes, planes, 1, dilation, False))
    return layer


def make_feature_extraction(kg):
    return {
        'firstconv': [make_convbn2d(kg, 3, 32, 3),
                      make_convbn2d(kg, 32, 32, 3),
                      make_convbn2d(kg, 32, 32, 3)],
        'layer1': make_layer(kg, 32, 32, 3, 1, 1),
        'layer2': make_layer(kg, 32, 64, 16, 2, 1),
        'layer3': make_layer(kg, 64, 128, 3, 1, 1),
        'layer4': make_layer(kg, 128, 128, 3, 1, 2),
        'branches': make_spp_branches(kg, 128, 32),
        'lastconv': [make_convbn2d(kg, 320, 128, 3),
                     make_conv2d(kg, 128, 32, 1)],
    }


def make_psmnet(kg, maxdisp):
    return {
        'maxdisp': maxdisp,
        'feature_extraction': make_feature_extraction(kg),
        'dres0': [make_convbn3d(kg, 64, 32), make_convbn3d(kg, 32, 32)],
        'dres1': [make_convbn3d(kg, 32, 32), make_convbn3d(kg, 32, 32)],
        'dres2': [make_convbn3d(kg, 32, 32), make_convbn3d(kg, 32, 32)],
        'dres3': [make_convbn3d(kg, 32, 32), make_convbn3d(kg, 32, 32)],
        'dres4': [make_convbn3d(kg, 32, 32), make_convbn3d(kg, 32, 32)],
        'classify': [make_convbn3d(kg, 32, 32), make_conv3d(kg, 32, 1)],
    }


# ----------------------------------------------------------------------------
# Forward pass
# ----------------------------------------------------------------------------
def basic_block_fwd(x, bp):
    d = bp['dilation']
    pad = d if d > 1 else 1
    out = convbn2d_fwd(x, bp['conv1'], k=3, stride=bp['stride'], pad=pad,
                       dilation=d, relu=True)
    shortcut = x
    if bp['downsample'] is not None:
        shortcut = convbn2d_fwd(x, bp['downsample'], k=1, stride=bp['stride'],
                                pad=0, dilation=1, relu=False)
    # conv2 + BN + residual add fused into one Pallas GEMM epilogue
    return convbn2d_fwd(out, bp['conv2'], k=3, stride=1, pad=pad, dilation=d,
                        relu=False, residual=shortcut)


@functools.partial(jax.jit, static_argnames=("bi", "pool"))
def _branch_pool_resize(y, *, bi, pool):
    N, H, W, _ = y.shape
    z = y[..., bi * 32:(bi + 1) * 32].astype(jnp.float32)
    z = z.reshape(N, H // pool, pool, W // pool, pool, 32).mean(axis=(2, 4))
    z = jnp.maximum(z, 0.0)
    z = jax.image.resize(z, (N, H, W, 32), method='bilinear')
    return z.astype(jnp.bfloat16)


def spp_branches_fwd(x, p):
    # The four SPP 1x1 convs (linear, so they commute with average pooling) are
    # applied once as a single lane-dense 128->128 GEMM; ReLU stays after pooling.
    y = conv2d_gemm(x, p['w'], p['b'], k=1, stride=1, pad=0, dilation=1,
                    relu=False, n_out=p['n_out'])
    return [_branch_pool_resize(y, bi=bi, pool=pool)
            for bi, pool in enumerate((64, 32, 16, 8))]


def feature_extraction_fwd(x, P):
    out = convbn2d_fwd(x, P['firstconv'][0], k=3, stride=2, pad=1, dilation=1, relu=True)
    out = convbn2d_fwd(out, P['firstconv'][1], k=3, stride=1, pad=1, dilation=1, relu=True)
    out = convbn2d_fwd(out, P['firstconv'][2], k=3, stride=1, pad=1, dilation=1, relu=True)
    for bp in P['layer1']:
        out = basic_block_fwd(out, bp)
    output_raw = out
    for bp in P['layer2']:
        output_raw = basic_block_fwd(output_raw, bp)
    output = output_raw
    for bp in P['layer3']:
        output = basic_block_fwd(output, bp)
    output_skip = output
    for bp in P['layer4']:
        output_skip = basic_block_fwd(output_skip, bp)
    b1, b2, b3, b4 = spp_branches_fwd(output_skip, P['branches'])
    feat = jnp.concatenate([output_raw, output_skip, b4, b3, b2, b1], axis=-1)
    feat = convbn2d_fwd(feat, P['lastconv'][0], k=3, stride=1, pad=1, dilation=1, relu=True)
    feat = convbn2d_fwd(feat, P['lastconv'][1], k=1, stride=1, pad=0, dilation=1, relu=False)
    return feat


def build_cost_volume(ref, tgt, D):
    """(N,H,W,C) x2 -> (N, D, H, W, 2C) matching torch cost[:, :, i, :, i:]."""
    # TODO(synk): build disparity shifts directly inside the dres0 kernel's index maps.
    N, H, W, C = ref.shape
    slices = []
    for i in range(D):
        if i > 0:
            zeros = jnp.zeros((N, H, i, C), ref.dtype)
            r = jnp.concatenate([zeros, ref[:, :, i:, :]], axis=2)
            t = jnp.concatenate([zeros, tgt[:, :, :W - i, :]], axis=2)
        else:
            r, t = ref, tgt
        slices.append(jnp.concatenate([r, t], axis=-1))
    return jnp.stack(slices, axis=1)


def psmnet_fwd(left, right, P):
    maxdisp = P['maxdisp']
    ref_fea = feature_extraction_fwd(left, P['feature_extraction'])
    tgt_fea = feature_extraction_fwd(right, P['feature_extraction'])
    D = maxdisp // 4
    cost = build_cost_volume(ref_fea, tgt_fea, D)

    cost0 = convbn3d_fwd(cost, P['dres0'][0], relu=True)
    cost0 = convbn3d_fwd(cost0, P['dres0'][1], relu=True)
    # each dres pair: first conv (ReLU), second conv with the residual add fused
    # into its GEMM epilogue (no separate full-volume add pass).
    for name in ('dres1', 'dres2', 'dres3', 'dres4'):
        y = convbn3d_fwd(cost0, P[name][0], relu=True)
        cost0 = convbn3d_fwd(y, P[name][1], relu=False, residual=cost0)

    c = convbn3d_fwd(cost0, P['classify'][0], relu=True)
    c = convbn3d_fwd(c, P['classify'][1], relu=False,
                     out_dtype=jnp.float32)                # (N, D, H/4, W/4, 1)
    c = jnp.squeeze(c, axis=-1)                            # (N, D, H/4, W/4)

    N = left.shape[0]
    H, W = left.shape[1], left.shape[2]
    # TODO(synk): fuse the trilinear upsample into the softmax/regression kernel
    # to avoid materializing the full-resolution cost volume at large sizes.
    c = jax.image.resize(c, (N, maxdisp, H, W), method='trilinear')
    return softmax_disparity_regression(c)                 # (N, H, W)


# ----------------------------------------------------------------------------
if __name__ == "__main__":
    maxdisp = 8
    # H, W must be >= 256: the SPP branch1 uses a 64x64 average pool on the
    # quarter-resolution feature map, exactly as the PyTorch module requires.
    N, H, W = 1, 256, 256

    _fold_reshape_supported()          # one-time probe for lane-dense stores

    params = make_psmnet(KeyGen(42), maxdisp)

    key = jax.random.PRNGKey(0)
    kl, kr = jax.random.split(key)
    left = jax.random.normal(kl, (N, H, W, 3), jnp.float32)
    right = jax.random.normal(kr, (N, H, W, 3), jnp.float32)

    pred = psmnet_fwd(left, right, params)
    pred = jax.block_until_ready(pred)
    assert pred.shape == (N, H, W), pred.shape
    assert bool(jnp.all(jnp.isfinite(pred)))
    print("KERNEL_OK")
</pallas_src>

<mosaic_0001>
module attributes {stable_mosaic.version = 11 : i64} {
  func.func @_gemm_kernel(%arg0: i32, %arg1: memref<2048x32xbf16, #tpu.memory_space<vmem>>, %arg2: memref<32x128xbf16, #tpu.memory_space<vmem>>, %arg3: memref<1x128xf32, #tpu.memory_space<vmem>>, %arg4: memref<2048x32xbf16, #tpu.memory_space<vmem>>) attributes {dimension_semantics = [#tpu.dimension_semantics<parallel>], iteration_bounds = array<i64: 8>, scalar_prefetch = 0 : i64, scratch_operands = 0 : i64, tpu.core_type = #tpu.core_type<tc>, window_params = [{transform_indices = @transform_0, window_bounds = array<i64: 2048, 32>}, {pipeline_mode = #tpu.pipeline_mode<synchronous>, transform_indices = @transform_1, window_bounds = array<i64: 32, 128>}, {pipeline_mode = #tpu.pipeline_mode<synchronous>, transform_indices = @transform_2, window_bounds = array<i64: 1, 128>}, {transform_indices = @transform_3, window_bounds = array<i64: 2048, 32>}]} {
    %c0 = arith.constant 0 : index
    %c0_0 = arith.constant 0 : index
    %0 = vector.load %arg1[%c0, %c0_0] : memref<2048x32xbf16, #tpu.memory_space<vmem>>, vector<2048x32xbf16>
    %c0_1 = arith.constant 0 : index
    %c0_2 = arith.constant 0 : index
    %1 = vector.load %arg2[%c0_1, %c0_2] : memref<32x128xbf16, #tpu.memory_space<vmem>>, vector<32x128xbf16>
    %cst = arith.constant dense<0.000000e+00> : vector<2048x128xf32>
    %2 = tpu.matmul %0, %1, %cst {dimension_numbers = #tpu.dot_dimension_numbers<[1], [0], [0], [1], [0, 0, 1, 1], [], []>} : vector<2048x32xbf16>, vector<32x128xbf16>, vector<2048x128xf32> -> vector<2048x128xf32>
    %c0_3 = arith.constant 0 : index
    %c0_4 = arith.constant 0 : index
    %3 = vector.load %arg3[%c0_3, %c0_4] : memref<1x128xf32, #tpu.memory_space<vmem>>, vector<1x128xf32>
    %4 = vector.broadcast %3 : vector<1x128xf32> to vector<2048x128xf32>
    %5 = arith.addf %2, %4 : vector<2048x128xf32>
    %cst_5 = arith.constant 0.000000e+00 : f32
    %6 = vector.broadcast %cst_5 : f32 to vector<2048x128xf32>
    %7 = arith.maximumf %5, %6 : vector<2048x128xf32>
    %8 = vector.extract_strided_slice %7 {offsets = [0, 0], sizes = [2048, 32], strides = [1, 1]} : vector<2048x128xf32> to vector<2048x32xf32>
    %9 = arith.truncf %8 : vector<2048x32xf32> to vector<2048x32xbf16>
    %c0_6 = arith.constant 0 : index
    %c0_7 = arith.constant 0 : index
    %10 = vector.load %arg4[%c0_6, %c0_7] : memref<2048x32xbf16, #tpu.memory_space<vmem>>, vector<2048x32xbf16>
    tpu.vector_store %arg4[%c0_6, %c0_7], %9 {strides = array<i32>} : memref<2048x32xbf16, #tpu.memory_space<vmem>>, vector<2048x32xbf16>,
    return
  }
  func.func @transform_0(%arg0: i32) -> (i32, i32) {
    %c0_i32 = arith.constant 0 : i32
    %c0_i32_0 = arith.constant 0 : i32
    return %arg0, %c0_i32 : i32, i32
  }
  func.func @transform_1(%arg0: i32) -> (i32, i32) {
    %c0_i32 = arith.constant 0 : i32
    %c0_i32_0 = arith.constant 0 : i32
    %c0_i32_1 = arith.constant 0 : i32
    return %c0_i32, %c0_i32_0 : i32, i32
  }
  func.func @transform_2(%arg0: i32) -> (i32, i32) {
    %c0_i32 = arith.constant 0 : i32
    %c0_i32_0 = arith.constant 0 : i32
    %c0_i32_1 = arith.constant 0 : i32
    return %c0_i32, %c0_i32_0 : i32, i32
  }
  func.func @transform_3(%arg0: i32) -> (i32, i32) {
    %c0_i32 = arith.constant 0 : i32
    %c0_i32_0 = arith.constant 0 : i32
    return %arg0, %c0_i32 : i32, i32
  }
}

</mosaic_0001>

<bundles_post_ra>
// kernel: conv2d_gemm.1
= control target key start
LH: loop header
LB: loop body
LE: loop exit
PB: predicated region body
PF: predicated region fallthrough
CT: control target
= control target key end

     0   :  { %s5473_s12 = smov 0   ;;  %s6546_s0 = inlined_call_operand.vmem [shape: bf16[16384,32], index: 0, kind: input, shape index: {}]   ;;  %s6547_s1 = inlined_call_operand.vmem [shape: bf16[32,128], index: 1, kind: input, shape index: {}]   ;;  %s6548_s2 = inlined_call_operand.vmem [shape: f32[1,128], index: 2, kind: input, shape index: {}]   ;;  %s6549_s3 = inlined_call_operand.vmem [shape: bf16[16384,32], index: 3, kind: output, shape index: {}]  }
   0x1 LB: > { %s4129_s13 = sadd.s32 4294967295, %s5451_s12   ;;  %p4133_p0 = scmp.ge.s32.totalorder %s5451_s12, 1  ;;  %s5451_s12 = sphi %s5473_s12, %s13_s12  }
   0x2   : > { %p138_p1 = scmp.lt.s32.totalorder %s5451_s12, 9 }
   0x4   : > { %p139_p2 = pnand %p4133_p0, %p138_p1 }
   0x5   : > { %v5313_v0 = vld [vmem:[%s6547_s1] sm:$0xff] (!%p139_p2)   ;;  %s4134_s16 = sshll.u32 (!%p139_p2), %s4129_s13, 8  ;;  %v5314_v1 = vld [vmem:[%s6547_s1 + $0x8] sm:$0xff] (!%p139_p2)   ;;  %vm1094_vm0 = vcmask (!%p139_p2), 261120   ;;  %vm3816_vm1 = vcmask (!%p139_p2), 257024  }
   0x6   : > { %142 = sbr.rel (%p139_p2) target bundleno = 489 (0x1e9), region = 32  ;;  %p163_p3 = scmp.lt.s32.totalorder (!%p139_p2), %s4134_s16, 2047  ;;  %5041 = vmatprep.subr.bf16.mxu0 (!%p139_p2), %v5313_v0  ;;  %5301 = vmatprep.subr.bf16.mxu1 (!%p139_p2), %v5313_v0 }
   0x7   : > { %5042 = vmatpush3.bf16.msra.mxu0 (!%p139_p2), %v5313_v0  ;;  %5303 = vmatpush3.bf16.msra.mxu1 (!%p139_p2), %v5313_v0 }
   0x8   : > { %5043 = vmatprep.subr.bf16.mxu0 (!%p139_p2), %v5314_v1  ;;  %5302 = vmatprep.subr.bf16.mxu1 (!%p139_p2), %v5314_v1 }
   0xb   : > { %5044 = vmatpush3.bf16.msra.mxu0 (!%p139_p2), %v5314_v1  ;;  %5304 = vmatpush3.bf16.msra.mxu1 (!%p139_p2), %v5314_v1 }
   0xd   : > { %s6551_s16 = smov (!%p163_p3, %s4134_s16), 2047 }
   0xe   : > { %s4135_s19 = sshll.u32 %s6551_s16, 2 }
   0xf   : > { %s5495_s22 = scalar_lea.vmem %s6546_s0, %s4135_s19  ;;  %s5736_s27 = scalar_lea.vmem %s6549_s3, %s4135_s19 }
  0x10   : > { %v5315_v2 = vld [vmem:[%s5495_s22] sm:$0xff]   ;;  %v5317_v4 = vld [vmem:[%s5495_s22 + $0x8] sm:$0xff]   ;;  %v5319_v6 = vld [vmem:[%s5495_s22 + $0x10] sm:$0xff]  }
  0x11   : > { %v5316_v3 = vld [vmem:[%s5495_s22 + $0x200] sm:$0xff]   ;;  %5045 = vmatprep.mubr.msk.bf16.mxu0 %vm1094_vm0, %v5315_v2  ;;  %v5318_v5 = vld [vmem:[%s5495_s22 + $0x208] sm:$0xff]   ;;  %v5320_v7 = vld [vmem:[%s5495_s22 + $0x210] sm:$0xff]  }
  0x12   : > { %5173 = vmatprep.mubr.msk.bf16.mxu1 %vm1094_vm0, %v5316_v3  ;;  %5046 = vmatmul.mubr.msk.bf16.vlgmr.msra.gmra.mrb[0].mxu0 %vm1094_vm0, %v5317_v4  ;;  %v5321_v8 = vld [vmem:[%s5495_s22 + $0x18] sm:$0xff]   ;;  %v5323_v10 = vld [vmem:[%s5495_s22 + $0x20] sm:$0xff]   ;;  %v5325_v12 = vld [vmem:[%s5495_s22 + $0x28] sm:$0xff]  }
  0x13   : > { %5174 = vmatmul.mubr.msk.bf16.vlgmr.msra.gmra.mrb[0].mxu1 %vm1094_vm0, %v5318_v5  ;;  %5049 = vmatprep.mubr.msk.bf16.mxu0 %vm1094_vm0, %v5319_v6  ;;  %v5322_v9 = vld [vmem:[%s5495_s22 + $0x218] sm:$0xff]   ;;  %v5324_v11 = vld [vmem:[%s5495_s22 + $0x220] sm:$0xff]   ;;  %v5326_v13 = vld [vmem:[%s5495_s22 + $0x228] sm:$0xff]  }
  0x14   : > { %5177 = vmatprep.mubr.msk.bf16.mxu1 %vm1094_vm0, %v5320_v7  ;;  %v5327_v14 = vld [vmem:[%s5495_s22 + $0x30] sm:$0xff]   ;;  %v5329_v16 = vld [vmem:[%s5495_s22 + $0x38] sm:$0xff]   ;;  %v5331_v18 = vld [vmem:[%s5495_s22 + $0x40] sm:$0xff]  }
  0x15   : > { %v5328_v15 = vld [vmem:[%s5495_s22 + $0x230] sm:$0xff]   ;;  %v5330_v17 = vld [vmem:[%s5495_s22 + $0x238] sm:$0xff]   ;;  %v5332_v19 = vld [vmem:[%s5495_s22 + $0x240] sm:$0xff]  }
  0x16   : > { %v5333_v20 = vld [vmem:[%s5495_s22 + $0x48] sm:$0xff]   ;;  %v5335_v22 = vld [vmem:[%s5495_s22 + $0x50] sm:$0xff]   ;;  %v5337_v24 = vld [vmem:[%s5495_s22 + $0x58] sm:$0xff]  }
  0x17   : > { %v5334_v21 = vld [vmem:[%s5495_s22 + $0x248] sm:$0xff]   ;;  %v5336_v23 = vld [vmem:[%s5495_s22 + $0x250] sm:$0xff]   ;;  %v5338_v25 = vld [vmem:[%s5495_s22 + $0x258] sm:$0xff]  }
  0x18   : > { %v5339_v26 = vld [vmem:[%s5495_s22 + $0x60] sm:$0xff]   ;;  %v5341_v28 = vld [vmem:[%s5495_s22 + $0x68] sm:$0xff]   ;;  %v5343_v30 = vld [vmem:[%s5495_s22 + $0x70] sm:$0xff]  }
  0x19   : > { %v5340_v27 = vld [vmem:[%s5495_s22 + $0x260] sm:$0xff]   ;;  %v5342_v29 = vld [vmem:[%s5495_s22 + $0x268] sm:$0xff]   ;;  %v5344_v31 = vld [vmem:[%s5495_s22 + $0x270] sm:$0xff]  }
  0x1a   : > { %5050 = vmatmul.mubr.msk.bf16.gmra.mrb[4].mxu0 %vm1094_vm0, %v5321_v8  ;;  %v5345_v32 = vld [vmem:[%s5495_s22 + $0x78] sm:$0xff]   ;;  %v5347_v34 = vld [vmem:[%s5495_s22 + $0x80] sm:$0xff]   ;;  %v5349_v36 = vld [vmem:[%s5495_s22 + $0x88] sm:$0xff]  }
  0x1b   : > { %5178 = vmatmul.mubr.msk.bf16.gmra.mrb[4].mxu1 %vm1094_vm0, %v5322_v9  ;;  %5053 = vmatprep.mubr.msk.bf16.mxu0 %vm1094_vm0, %v5323_v10  ;;  %v5346_v33 = vld [vmem:[%s5495_s22 + $0x278] sm:$0xff]   ;;  %v5348_v35 = vld [vmem:[%s5495_s22 + $0x280] sm:$0xff]   ;;  %v5350_v37 = vld [vmem:[%s5495_s22 + $0x288] sm:$0xff]  }
  0x1c   : > { %5181 = vmatprep.mubr.msk.bf16.mxu1 %vm1094_vm0, %v5324_v11  ;;  %v5351_v38 = vld [vmem:[%s5495_s22 + $0x90] sm:$0xff]   ;;  %v5353_v40 = vld [vmem:[%s5495_s22 + $0x98] sm:$0xff]   ;;  %v5355_v42 = vld [vmem:[%s5495_s22 + $0xa0] sm:$0xff]  }
  0x1d   : > { %v5352_v39 = vld [vmem:[%s5495_s22 + $0x290] sm:$0xff]   ;;  %v5354_v41 = vld [vmem:[%s5495_s22 + $0x298] sm:$0xff]   ;;  %v5356_v43 = vld [vmem:[%s5495_s22 + $0x2a0] sm:$0xff]  }
  0x1e   : > { %v5357_v44 = vld [vmem:[%s5495_s22 + $0xa8] sm:$0xff]   ;;  %v5359_v46 = vld [vmem:[%s5495_s22 + $0xb0] sm:$0xff]   ;;  %v5361_v48 = vld [vmem:[%s5495_s22 + $0xb8] sm:$0xff]  }
  0x1f   : > { %v5358_v45 = vld [vmem:[%s5495_s22 + $0x2a8] sm:$0xff]   ;;  %v5360_v47 = vld [vmem:[%s5495_s22 + $0x2b0] sm:$0xff]   ;;  %v5362_v49 = vld [vmem:[%s5495_s22 + $0x2b8] sm:$0xff]  }
  0x20   : > { %v5363_v50 = vld [vmem:[%s5495_s22 + $0xc0] sm:$0xff]   ;;  %v5365_v52 = vld [vmem:[%s5495_s22 + $0xc8] sm:$0xff]   ;;  %v5367_v54 = vld [vmem:[%s5495_s22 + $0xd0] sm:$0xff]  }
  0x21   : > { %v5364_v51 = vld [vmem:[%s5495_s22 + $0x2c0] sm:$0xff]   ;;  %v5366_v53 = vld [vmem:[%s5495_s22 + $0x2c8] sm:$0xff]   ;;  %v5368_v55 = vld [vmem:[%s5495_s22 + $0x2d0] sm:$0xff]  }
  0x22   : > { %5054 = vmatmul.mubr.msk.bf16.gmra.mrb[8].mxu0 %vm1094_vm0, %v5325_v12  ;;  %v5369_v56 = vld [vmem:[%s5495_s22 + $0xd8] sm:$0xff]   ;;  %v5371_v58 = vld [vmem:[%s5495_s22 + $0xe0] sm:$0xff]   ;;  %v5373_v60 = vld [vmem:[%s5495_s22 + $0xe8] sm:$0xff]  }
  0x23   : > { %5182 = vmatmul.mubr.msk.bf16.gmra.mrb[8].mxu1 %vm1094_vm0, %v5326_v13  ;;  %5057 = vmatprep.mubr.msk.bf16.mxu0 %vm1094_vm0, %v5327_v14  ;;  %v5370_v57 = vld [vmem:[%s5495_s22 + $0x2d8] sm:$0xff]   ;;  %v5372_v59 = vld [vmem:[%s5495_s22 + $0x2e0] sm:$0xff]   ;;  %v5374_v61 = vld [vmem:[%s5495_s22 + $0x2e8] sm:$0xff]  }
  0x24   : > { %5185 = vmatprep.mubr.msk.bf16.mxu1 %vm1094_vm0, %v5328_v15  ;;  %v5375_v62 = vld [vmem:[%s5495_s22 + $0xf0] sm:$0xff]   ;;  %v5377_v0 = vld [vmem:[%s5495_s22 + $0xf8] sm:$0xff]   ;;  %v5379_v2 = vld [vmem:[%s5495_s22 + $0x100] sm:$0xff]  }
  0x25   : > { %v5376_v63 = vld [vmem:[%s5495_s22 + $0x2f0] sm:$0xff]   ;;  %v5378_v1 = vld [vmem:[%s5495_s22 + $0x2f8] sm:$0xff]   ;;  %v5380_v3 = vld [vmem:[%s5495_s22 + $0x300] sm:$0xff]  }
  0x26   : > { %v5381_v4 = vld [vmem:[%s5495_s22 + $0x108] sm:$0xff]   ;;  %v5383_v6 = vld [vmem:[%s5495_s22 + $0x110] sm:$0xff]   ;;  %v5385_v8 = vld [vmem:[%s5495_s22 + $0x118] sm:$0xff]  }
  0x27   : > { %v5382_v5 = vld [vmem:[%s5495_s22 + $0x308] sm:$0xff]   ;;  %v5384_v7 = vld [vmem:[%s5495_s22 + $0x310] sm:$0xff]   ;;  %v5386_v9 = vld [vmem:[%s5495_s22 + $0x318] sm:$0xff]  }
  0x28   : > { %v5387_v10 = vld [vmem:[%s5495_s22 + $0x120] sm:$0xff]   ;;  %v5389_v12 = vld [vmem:[%s5495_s22 + $0x128] sm:$0xff]   ;;  %v5391_v14 = vld [vmem:[%s5495_s22 + $0x130] sm:$0xff]  }
  0x29   : > { %v5388_v11 = vld [vmem:[%s5495_s22 + $0x320] sm:$0xff]   ;;  %v5390_v13 = vld [vmem:[%s5495_s22 + $0x328] sm:$0xff]   ;;  %v5392_v15 = vld [vmem:[%s5495_s22 + $0x330] sm:$0xff]  }
  0x2a   : > { %5058 = vmatmul.mubr.msk.bf16.gmra.mrb[12].mxu0 %vm1094_vm0, %v5329_v16  ;;  %v5393_v16 = vld [vmem:[%s5495_s22 + $0x138] sm:$0xff]  }
  0x2b   : > { %5186 = vmatmul.mubr.msk.bf16.gmra.mrb[12].mxu1 %vm1094_vm0, %v5330_v17  ;;  %5061 = vmatprep.mubr.msk.bf16.mxu0 %vm1094_vm0, %v5331_v18  ;;  %v5394_v17 = vld [vmem:[%s5495_s22 + $0x338] sm:$0xff]   ;;  %v5395_v18 = vld [vmem:[%s5495_s22 + $0x140] sm:$0xff]  }
  0x2c   : > { %5189 = vmatprep.mubr.msk.bf16.mxu1 %vm1094_vm0, %v5332_v19  ;;  %v5396_v19 = vld [vmem:[%s5495_s22 + $0x340] sm:$0xff]  }
  0x32   : > { %5062 = vmatmul.mubr.msk.bf16.gmra.mrb[16].mxu0 %vm1094_vm0, %v5333_v20  ;;  %v5397_v20 = vld [vmem:[%s5495_s22 + $0x148] sm:$0xff]  }
  0x33   : > { %5190 = vmatmul.mubr.msk.bf16.gmra.mrb[16].mxu1 %vm1094_vm0, %v5334_v21  ;;  %5065 = vmatprep.mubr.msk.bf16.mxu0 %vm1094_vm0, %v5335_v22  ;;  %v5398_v21 = vld [vmem:[%s5495_s22 + $0x348] sm:$0xff]   ;;  %v5399_v22 = vld [vmem:[%s5495_s22 + $0x150] sm:$0xff]  }
  0x34   : > { %5193 = vmatprep.mubr.msk.bf16.mxu1 %vm1094_vm0, %v5336_v23  ;;  %v5400_v23 = vld [vmem:[%s5495_s22 + $0x350] sm:$0xff]  }
  0x3a   : > { %5066 = vmatmul.mubr.msk.bf16.gmra.mrb[20].mxu0 %vm1094_vm0, %v5337_v24  ;;  %v5401_v24 = vld [vmem:[%s5495_s22 + $0x158] sm:$0xff]  }
  0x3b   : > { %5194 = vmatmul.mubr.msk.bf16.gmra.mrb[20].mxu1 %vm1094_vm0, %v5338_v25  ;;  %5069 = vmatprep.mubr.msk.bf16.mxu0 %vm1094_vm0, %v5339_v26  ;;  %v5402_v25 = vld [vmem:[%s5495_s22 + $0x358] sm:$0xff]   ;;  %v5403_v26 = vld [vmem:[%s5495_s22 + $0x160] sm:$0xff]  }
  0x3c   : > { %5197 = vmatprep.mubr.msk.bf16.mxu1 %vm1094_vm0, %v5340_v27  ;;  %v5404_v27 = vld [vmem:[%s5495_s22 + $0x360] sm:$0xff]  }
  0x42   : > { %5070 = vmatmul.mubr.msk.bf16.gmra.mrb[24].mxu0 %vm1094_vm0, %v5341_v28  ;;  %v5405_v28 = vld [vmem:[%s5495_s22 + $0x168] sm:$0xff]  }
  0x43   : > { %5198 = vmatmul.mubr.msk.bf16.gmra.mrb[24].mxu1 %vm1094_vm0, %v5342_v29  ;;  %5073 = vmatprep.mubr.msk.bf16.mxu0 %vm1094_vm0, %v5343_v30  ;;  %v5406_v29 = vld [vmem:[%s5495_s22 + $0x368] sm:$0xff]   ;;  %v5407_v30 = vld [vmem:[%s5495_s22 + $0x170] sm:$0xff]  }
  0x44   : > { %5201 = vmatprep.mubr.msk.bf16.mxu1 %vm1094_vm0, %v5344_v31  ;;  %v5408_v31 = vld [vmem:[%s5495_s22 + $0x370] sm:$0xff]  }
  0x4a   : > { %5074 = vmatmul.mubr.msk.bf16.gmra.mrb[28].mxu0 %vm1094_vm0, %v5345_v32  ;;  %v5409_v32 = vld [vmem:[%s5495_s22 + $0x178] sm:$0xff]  }
  0x4b   : > { %5202 = vmatmul.mubr.msk.bf16.gmra.mrb[28].mxu1 %vm1094_vm0, %v5346_v33  ;;  %5077 = vmatprep.mubr.msk.bf16.mxu0 %vm1094_vm0, %v5347_v34  ;;  %v5410_v33 = vld [vmem:[%s5495_s22 + $0x378] sm:$0xff]   ;;  %v5411_v34 = vld [vmem:[%s5495_s22 + $0x180] sm:$0xff]  }
  0x4c   : > { %5205 = vmatprep.mubr.msk.bf16.mxu1 %vm1094_vm0, %v5348_v35  ;;  %v5412_v35 = vld [vmem:[%s5495_s22 + $0x380] sm:$0xff]  }
  0x52   : > { %5078 = vmatmul.mubr.msk.bf16.gmra.mrb[32].mxu0 %vm1094_vm0, %v5349_v36  ;;  %v5413_v36 = vld [vmem:[%s5495_s22 + $0x188] sm:$0xff]  }
  0x53   : > { %5206 = vmatmul.mubr.msk.bf16.gmra.mrb[32].mxu1 %vm1094_vm0, %v5350_v37  ;;  %5081 = vmatprep.mubr.msk.bf16.mxu0 %vm1094_vm0, %v5351_v38  ;;  %v5414_v37 = vld [vmem:[%s5495_s22 + $0x388] sm:$0xff]   ;;  %v5415_v38 = vld [vmem:[%s5495_s22 + $0x190] sm:$0xff]  }
  0x54   : > { %5209 = vmatprep.mubr.msk.bf16.mxu1 %vm1094_vm0, %v5352_v39  ;;  %v5416_v39 = vld [vmem:[%s5495_s22 + $0x390] sm:$0xff]  }
  0x5a   : > { %5082 = vmatmul.mubr.msk.bf16.gmra.mrb[36].mxu0 %vm1094_vm0, %v5353_v40  ;;  %v5417_v40 = vld [vmem:[%s5495_s22 + $0x198] sm:$0xff]  }
  0x5b   : > { %5210 = vmatmul.mubr.msk.bf16.gmra.mrb[36].mxu1 %vm1094_vm0, %v5354_v41  ;;  %5085 = vmatprep.mubr.msk.bf16.mxu0 %vm1094_vm0, %v5355_v42  ;;  %v5418_v41 = vld [vmem:[%s5495_s22 + $0x398] sm:$0xff]   ;;  %v5419_v42 = vld [vmem:[%s5495_s22 + $0x1a0] sm:$0xff]  }
  0x5c   : > { %5213 = vmatprep.mubr.msk.bf16.mxu1 %vm1094_vm0, %v5356_v43  ;;  %v5420_v43 = vld [vmem:[%s5495_s22 + $0x3a0] sm:$0xff]  }
  0x62   : > { %5086 = vmatmul.mubr.msk.bf16.gmra.mrb[40].mxu0 %vm1094_vm0, %v5357_v44  ;;  %v5421_v44 = vld [vmem:[%s5495_s22 + $0x1a8] sm:$0xff]  }
  0x63   : > { %5214 = vmatmul.mubr.msk.bf16.gmra.mrb[40].mxu1 %vm1094_vm0, %v5358_v45  ;;  %5089 = vmatprep.mubr.msk.bf16.mxu0 %vm1094_vm0, %v5359_v46  ;;  %v5422_v45 = vld [vmem:[%s5495_s22 + $0x3a8] sm:$0xff]   ;;  %v5423_v46 = vld [vmem:[%s5495_s22 + $0x1b0] sm:$0xff]  }
  0x64   : > { %5217 = vmatprep.mubr.msk.bf16.mxu1 %vm1094_vm0, %v5360_v47  ;;  %v5424_v47 = vld [vmem:[%s5495_s22 + $0x3b0] sm:$0xff]  }
  0x6a   : > { %5090 = vmatmul.mubr.msk.bf16.gmra.mrb[44].mxu0 %vm1094_vm0, %v5361_v48  ;;  %v5718_v48 = vld [vmem:[%s6548_s2] ss:$0 sm:$0xff] }
  0x6b   : > { %5218 = vmatmul.mubr.msk.bf16.gmra.mrb[44].mxu1 %vm1094_vm0, %v5362_v49  ;;  %5093 = vmatprep.mubr.msk.bf16.mxu0 %vm1094_vm0, %v5363_v50 }
  0x6c   : > { %5221 = vmatprep.mubr.msk.bf16.mxu1 %vm1094_vm0, %v5364_v51 }
  0x72   : > { %5094 = vmatmul.mubr.msk.bf16.gmra.mrb[48].mxu0 %vm1094_vm0, %v5365_v52 }
  0x73   : > { %5222 = vmatmul.mubr.msk.bf16.gmra.mrb[48].mxu1 %vm1094_vm0, %v5366_v53  ;;  %5097 = vmatprep.mubr.msk.bf16.mxu0 %vm1094_vm0, %v5367_v54  ;;  %v5425_v53 = vld [vmem:[%s5495_s22 + $0x1b8] sm:$0xff]  }
  0x74   : > { %5225 = vmatprep.mubr.msk.bf16.mxu1 %vm1094_vm0, %v5368_v55 }
  0x7a   : > { %5098 = vmatmul.mubr.msk.bf16.gmra.mrb[52].mxu0 %vm1094_vm0, %v5369_v56 }
  0x7b   : > { %5226 = vmatmul.mubr.msk.bf16.gmra.mrb[52].mxu1 %vm1094_vm0, %v5370_v57  ;;  %5101 = vmatprep.mubr.msk.bf16.mxu0 %vm1094_vm0, %v5371_v58  ;;  %v5426_v58 = vld [vmem:[%s5495_s22 + $0x3b8] sm:$0xff]  }
  0x7c   : > { %5229 = vmatprep.mubr.msk.bf16.mxu1 %vm1094_vm0, %v5372_v59  ;;  %v5427_v59 = vld [vmem:[%s5495_s22 + $0x1c0] sm:$0xff]  }
  0x82   : > { %5102 = vmatmul.mubr.msk.bf16.gmra.mrb[56].mxu0 %vm1094_vm0, %v5373_v60 }
  0x83   : > { %5230 = vmatmul.mubr.msk.bf16.gmra.mrb[56].mxu1 %vm1094_vm0, %v5374_v61  ;;  %5105 = vmatprep.mubr.msk.bf16.mxu0 %vm1094_vm0, %v5375_v62 }
  0x84   : > { %5233 = vmatprep.mubr.msk.bf16.mxu1 %vm1094_vm0, %v5376_v63 }
  0x8a   : > { %5106 = vmatmul.mubr.msk.bf16.gmra.mrb[60].mxu0 %vm1094_vm0, %v5377_v0 }
  0x8b   : > { %5234 = vmatmul.mubr.msk.bf16.gmra.mrb[60].mxu1 %vm1094_vm0, %v5378_v1  ;;  %5109 = vmatprep.mubr.msk.bf16.mxu0 %vm1094_vm0, %v5379_v2  ;;  %v5428_v1 = vld [vmem:[%s5495_s22 + $0x3c0] sm:$0xff]  }
  0x8c   : > { %5237 = vmatprep.mubr.msk.bf16.mxu1 %vm1094_vm0, %v5380_v3 }
  0x92   : > { %5110 = vmatmul.mubr.msk.bf16.gmra.mrb[64].mxu0 %vm1094_vm0, %v5381_v4 }
  0x93   : > { %5238 = vmatmul.mubr.msk.bf16.gmra.mrb[64].mxu1 %vm1094_vm0, %v5382_v5  ;;  %5113 = vmatprep.mubr.msk.bf16.mxu0 %vm1094_vm0, %v5383_v6 }
  0x94   : > { %5241 = vmatprep.mubr.msk.bf16.mxu1 %vm1094_vm0, %v5384_v7 }
  0x9a   : > { %5114 = vmatmul.mubr.msk.bf16.gmra.mrb[68].mxu0 %vm1094_vm0, %v5385_v8 }
  0x9b   : > { %5242 = vmatmul.mubr.msk.bf16.gmra.mrb[68].mxu1 %vm1094_vm0, %v5386_v9  ;;  %5117 = vmatprep.mubr.msk.bf16.mxu0 %vm1094_vm0, %v5387_v10 }
  0x9c   : > { %5245 = vmatprep.mubr.msk.bf16.mxu1 %vm1094_vm0, %v5388_v11 }
  0xa2   : > { %5118 = vmatmul.mubr.msk.bf16.gmra.mrb[72].mxu0 %vm1094_vm0, %v5389_v12 }
  0xa3   : > { %5246 = vmatmul.mubr.msk.bf16.gmra.mrb[72].mxu1 %vm1094_vm0, %v5390_v13  ;;  %5121 = vmatprep.mubr.msk.bf16.mxu0 %vm1094_vm0, %v5391_v14 }
  0xa4   : > { %5249 = vmatprep.mubr.msk.bf16.mxu1 %vm1094_vm0, %v5392_v15 }
  0xaa   : > { %5122 = vmatmul.mubr.msk.bf16.gmra.mrb[76].mxu0 %vm1094_vm0, %v5393_v16 }
  0xab   : > { %5250 = vmatmul.mubr.msk.bf16.gmra.mrb[76].mxu1 %vm1094_vm0, %v5394_v17  ;;  %5125 = vmatprep.mubr.msk.bf16.mxu0 %vm1094_vm0, %v5395_v18 }
  0xac   : > { %5253 = vmatprep.mubr.msk.bf16.mxu1 %vm1094_vm0, %v5396_v19 }
  0xb2   : > { %5126 = vmatmul.mubr.msk.bf16.gmra.mrb[80].mxu0 %vm1094_vm0, %v5397_v20 }
  0xb3   : > { %5254 = vmatmul.mubr.msk.bf16.gmra.mrb[80].mxu1 %vm1094_vm0, %v5398_v21  ;;  %5129 = vmatprep.mubr.msk.bf16.mxu0 %vm1094_vm0, %v5399_v22 }
  0xb4   : > { %5257 = vmatprep.mubr.msk.bf16.mxu1 %vm1094_vm0, %v5400_v23 }
  0xba   : > { %5130 = vmatmul.mubr.msk.bf16.gmra.mrb[84].mxu0 %vm1094_vm0, %v5401_v24 }
  0xbb   : > { %5258 = vmatmul.mubr.msk.bf16.gmra.mrb[84].mxu1 %vm1094_vm0, %v5402_v25  ;;  %5133 = vmatprep.mubr.msk.bf16.mxu0 %vm1094_vm0, %v5403_v26  ;;  %v5429_v25 = vld [vmem:[%s5495_s22 + $0x1c8] sm:$0xff]  }
  0xbc   : > { %5261 = vmatprep.mubr.msk.bf16.mxu1 %vm1094_vm0, %v5404_v27 }
  0xc2   : > { %5134 = vmatmul.mubr.msk.bf16.gmra.mrb[88].mxu0 %vm1094_vm0, %v5405_v28 }
  0xc3   : > { %5262 = vmatmul.mubr.msk.bf16.gmra.mrb[88].mxu1 %vm1094_vm0, %v5406_v29  ;;  %5137 = vmatprep.mubr.msk.bf16.mxu0 %vm1094_vm0, %v5407_v30  ;;  %v5430_v30 = vld [vmem:[%s5495_s22 + $0x3c8] sm:$0xff]  }
  0xc4   : > { %5265 = vmatprep.mubr.msk.bf16.mxu1 %vm1094_vm0, %v5408_v31  ;;  %v5431_v31 = vld [vmem:[%s5495_s22 + $0x1d0] sm:$0xff]  }
  0xca   : > { %5138 = vmatmul.mubr.msk.bf16.gmra.mrb[92].mxu0 %vm1094_vm0, %v5409_v32 }
  0xcb   : > { %5266 = vmatmul.mubr.msk.bf16.gmra.mrb[92].mxu1 %vm1094_vm0, %v5410_v33  ;;  %5141 = vmatprep.mubr.msk.bf16.mxu0 %vm1094_vm0, %v5411_v34 }
  0xcc   : > { %5269 = vmatprep.mubr.msk.bf16.mxu1 %vm1094_vm0, %v5412_v35 }
  0xd2   : > { %5142 = vmatmul.mubr.msk.bf16.gmra.mrb[96].mxu0 %vm1094_vm0, %v5413_v36 }
  0xd3   : > { %5270 = vmatmul.mubr.msk.bf16.gmra.mrb[96].mxu1 %vm1094_vm0, %v5414_v37  ;;  %5145 = vmatprep.mubr.msk.bf16.mxu0 %vm1094_vm0, %v5415_v38  ;;  %v5432_v37 = vld [vmem:[%s5495_s22 + $0x3d0] sm:$0xff]  }
  0xd4   : > { %5273 = vmatprep.mubr.msk.bf16.mxu1 %vm1094_vm0, %v5416_v39 }
  0xda   : > { %5146 = vmatmul.mubr.msk.bf16.gmra.mrb[100].mxu0 %vm1094_vm0, %v5417_v40 }
  0xdb   : > { %5274 = vmatmul.mubr.msk.bf16.gmra.mrb[100].mxu1 %vm1094_vm0, %v5418_v41  ;;  %5149 = vmatprep.mubr.msk.bf16.mxu0 %vm1094_vm0, %v5419_v42 }
  0xdc   : > { %5277 = vmatprep.mubr.msk.bf16.mxu1 %vm1094_vm0, %v5420_v43 }
  0xe2   : > { %5150 = vmatmul.mubr.msk.bf16.gmra.mrb[104].mxu0 %vm1094_vm0, %v5421_v44 }
  0xe3   : > { %5278 = vmatmul.mubr.msk.bf16.gmra.mrb[104].mxu1 %vm1094_vm0, %v5422_v45  ;;  %5153 = vmatprep.mubr.msk.bf16.mxu0 %vm1094_vm0, %v5423_v46 }
  0xe4   : > { %5281 = vmatprep.mubr.msk.bf16.mxu1 %vm1094_vm0, %v5424_v47 }
  0xe5   : > { %v5047_v49 = vpop.f32.mrb[0].mxu0 }
  0xe6   : > { %v1522_v50 = vadd.f32 %v5047_v49, %v5718_v48  ;;  %v5175_v51 = vpop.f32.mrb[0].mxu1  ;;  %v1513_v52 = vpop.f32.mrb[1].mxu0 }
  0xe7   : > { %v2034_v54 = vadd.f32 %v5175_v51, %v5718_v48  ;;  %v1514_v55 = vadd.f32 %v5718_v48, %v1513_v52  ;;  %v2025_v56 = vpop.f32.mrb[1].mxu1  ;;  %v5048_v57 = vpop.f32.mrb[2].mxu0 }
  0xe8   : > { %v2538_v60 = vmax.f32 %v1522_v50, 0.0  ;;  %v2026_v61 = vadd.f32 %v5718_v48, %v2025_v56  ;;  %v1525_v62 = vadd.f32 %v5048_v57, %v5718_v48  ;;  %v5176_v63 = vpop.f32.mrb[2].mxu1  ;;  %v1516_v0 = vpop.f32.mrb[3].mxu0 }
  0xe9   : > { %v2666_v2 = vmax.f32 %v2034_v54, 0.0  ;;  %v2536_v3 = vmax.f32 %v1514_v55, 0.0  ;;  %v2037_v4 = vadd.f32 %v5176_v63, %v5718_v48  ;;  %v1517_v5 = vadd.f32 %v5718_v48, %v1516_v0  ;;  %v2028_v6 = vpop.f32.mrb[3].mxu1 }
  0xea   : > { %v4657_v7 = vpack.c.bf16 %v2538_v60, %v2538_v60  ;;  %v2664_v8 = vmax.f32 %v2026_v61, 0.0  ;;  %v2539_v9 = vmax.f32 %v1525_v62, 0.0  ;;  %v2029_v10 = vadd.f32 %v5718_v48, %v2028_v6  ;;  %5154 = vmatmul.mubr.msk.bf16.gmra.mrb[108].mxu0 %vm1094_vm0, %v5425_v53  ;;  %v5433_v62 = vld [vmem:[%s5495_s22 + $0x1d8] sm:$0xff]  }
  0xeb   : > { %v4785_v11 = vpack.c.bf16 %v2666_v2, %v2666_v2  ;;  %v4655_v12 = vpack.c.bf16 %v2536_v3, %v2536_v3  ;;  %v2667_v13 = vmax.f32 %v2037_v4, 0.0  ;;  %v2537_v14 = vmax.f32 %v1517_v5, 0.0  ;;  %5282 = vmatmul.mubr.msk.bf16.gmra.mrb[108].mxu1 %vm1094_vm0, %v5426_v58  ;;  %5157 = vmatprep.mubr.msk.bf16.mxu0 %vm1094_vm0, %v5427_v59  ;;  %v5434_v3 = vld [vmem:[%s5495_s22 + $0x3d8] sm:$0xff]   ;;  %v5435_v4 = vld [vmem:[%s5495_s22 + $0x1e0] sm:$0xff]  }
  0xec   : > { %3819 = vst.msk [vmem:[%s5736_s27 + $0x8] sm:$0xf] %vm3816_vm1, %v4657_v7  ;;  %v4783_v15 = vpack.c.bf16 %v2664_v8, %v2664_v8  ;;  %v4658_v16 = vpack.c.bf16 %v2539_v9, %v2539_v9  ;;  %v2665_v17 = vmax.f32 %v2029_v10, 0.0  ;;  %5285 = vmatprep.mubr.msk.bf16.mxu1 %vm1094_vm0, %v5428_v1  ;;  %v5436_v10 = vld [vmem:[%s5495_s22 + $0x3e0] sm:$0xff]  }
  0xed   : > { %3947 = vst.msk [vmem:[%s5736_s27 + $0x208] sm:$0xf] %vm3816_vm1, %v4785_v11  ;;  %3817 = vst.msk [vmem:[%s5736_s27] sm:$0xf] %vm3816_vm1, %v4655_v12  ;;  %v4786_v18 = vpack.c.bf16 %v2667_v13, %v2667_v13  ;;  %v4656_v19 = vpack.c.bf16 %v2537_v14, %v2537_v14  ;;  %v5051_v20 = vpop.f32.mrb[4].mxu0 }
  0xee   : > { %3945 = vst.msk [vmem:[%s5736_s27 + $0x200] sm:$0xf] %vm3816_vm1, %v4783_v15  ;;  %3820 = vst.msk [vmem:[%s5736_s27 + $0xc] sm:$0xf] %vm3816_vm1, %v4658_v16  ;;  %v4784_v21 = vpack.c.bf16 %v2665_v17, %v2665_v17  ;;  %v1538_v22 = vadd.f32 %v5051_v20, %v5718_v48  ;;  %v5179_v23 = vpop.f32.mrb[4].mxu1  ;;  %v1529_v24 = vpop.f32.mrb[5].mxu0 }
  0xef   : > { %3948 = vst.msk [vmem:[%s5736_s27 + $0x20c] sm:$0xf] %vm3816_vm1, %v4786_v18  ;;  %3818 = vst.msk [vmem:[%s5736_s27 + $0x4] sm:$0xf] %vm3816_vm1, %v4656_v19  ;;  %v2050_v26 = vadd.f32 %v5179_v23, %v5718_v48  ;;  %v1530_v27 = vadd.f32 %v5718_v48, %v1529_v24  ;;  %v2041_v28 = vpop.f32.mrb[5].mxu1  ;;  %v5052_v29 = vpop.f32.mrb[6].mxu0 }
  0xf0   : > { %3946 = vst.msk [vmem:[%s5736_s27 + $0x204] sm:$0xf] %vm3816_vm1, %v4784_v21  ;;  %v2542_v32 = vmax.f32 %v1538_v22, 0.0  ;;  %v2042_v33 = vadd.f32 %v5718_v48, %v2041_v28  ;;  %v1541_v34 = vadd.f32 %v5052_v29, %v5718_v48  ;;  %v5180_v35 = vpop.f32.mrb[6].mxu1  ;;  %v1532_v36 = vpop.f32.mrb[7].mxu0 }
  0xf1   : > { %v2670_v38 = vmax.f32 %v2050_v26, 0.0  ;;  %v2540_v39 = vmax.f32 %v1530_v27, 0.0  ;;  %v2053_v40 = vadd.f32 %v5180_v35, %v5718_v48  ;;  %v1533_v41 = vadd.f32 %v5718_v48, %v1532_v36  ;;  %v2044_v42 = vpop.f32.mrb[7].mxu1 }
  0xf2   : > { %v4661_v43 = vpack.c.bf16 %v2542_v32, %v2542_v32  ;;  %v2668_v44 = vmax.f32 %v2042_v33, 0.0  ;;  %v2543_v45 = vmax.f32 %v1541_v34, 0.0  ;;  %v2045_v46 = vadd.f32 %v5718_v48, %v2044_v42  ;;  %5158 = vmatmul.mubr.msk.bf16.gmra.mrb[112].mxu0 %vm1094_vm0, %v5429_v25  ;;  %v5437_v34 = vld [vmem:[%s5495_s22 + $0x1e8] sm:$0xff]  }
  0xf3   : > { %v4789_v47 = vpack.c.bf16 %v2670_v38, %v2670_v38  ;;  %v4659_v49 = vpack.c.bf16 %v2540_v39, %v2540_v39  ;;  %v2671_v50 = vmax.f32 %v2053_v40, 0.0  ;;  %v2541_v51 = vmax.f32 %v1533_v41, 0.0  ;;  %5286 = vmatmul.mubr.msk.bf16.gmra.mrb[112].mxu1 %vm1094_vm0, %v5430_v30  ;;  %5161 = vmatprep.mubr.msk.bf16.mxu0 %vm1094_vm0, %v5431_v31  ;;  %v5438_v39 = vld [vmem:[%s5495_s22 + $0x3e8] sm:$0xff]   ;;  %v5439_v40 = vld [vmem:[%s5495_s22 + $0x1f0] sm:$0xff]  }
  0xf4   : > { %3823 = vst.msk [vmem:[%s5736_s27 + $0x18] sm:$0xf] %vm3816_vm1, %v4661_v43  ;;  %v4787_v52 = vpack.c.bf16 %v2668_v44, %v2668_v44  ;;  %v4662_v53 = vpack.c.bf16 %v2543_v45, %v2543_v45  ;;  %v2669_v54 = vmax.f32 %v2045_v46, 0.0  ;;  %5289 = vmatprep.mubr.msk.bf16.mxu1 %vm1094_vm0, %v5432_v37  ;;  %v5440_v46 = vld [vmem:[%s5495_s22 + $0x3f0] sm:$0xff]  }
  0xf5   : > { %3951 = vst.msk [vmem:[%s5736_s27 + $0x218] sm:$0xf] %vm3816_vm1, %v4789_v47  ;;  %3821 = vst.msk [vmem:[%s5736_s27 + $0x10] sm:$0xf] %vm3816_vm1, %v4659_v49  ;;  %v4790_v55 = vpack.c.bf16 %v2671_v50, %v2671_v50  ;;  %v4660_v56 = vpack.c.bf16 %v2541_v51, %v2541_v51  ;;  %v5055_v57 = vpop.f32.mrb[8].mxu0 }
  0xf6   : > { %3949 = vst.msk [vmem:[%s5736_s27 + $0x210] sm:$0xf] %vm3816_vm1, %v4787_v52  ;;  %3824 = vst.msk [vmem:[%s5736_s27 + $0x1c] sm:$0xf] %vm3816_vm1, %v4662_v53  ;;  %v4788_v58 = vpack.c.bf16 %v2669_v54, %v2669_v54  ;;  %v1554_v59 = vadd.f32 %v5055_v57, %v5718_v48  ;;  %v5183_v60 = vpop.f32.mrb[8].mxu1  ;;  %v1545_v61 = vpop.f32.mrb[9].mxu0 }
  0xf7   : > { %3952 = vst.msk [vmem:[%s5736_s27 + $0x21c] sm:$0xf] %vm3816_vm1, %v4790_v55  ;;  %3822 = vst.msk [vmem:[%s5736_s27 + $0x14] sm:$0xf] %vm3816_vm1, %v4660_v56  ;;  %v2066_v63 = vadd.f32 %v5183_v60, %v5718_v48  ;;  %v1546_v0 = vadd.f32 %v5718_v48, %v1545_v61  ;;  %v2057_v1 = vpop.f32.mrb[9].mxu1  ;;  %v5056_v2 = vpop.f32.mrb[10].mxu0 }
  0xf8   : > { %3950 = vst.msk [vmem:[%s5736_s27 + $0x214] sm:$0xf] %vm3816_vm1, %v4788_v58  ;;  %v2546_v5 = vmax.f32 %v1554_v59, 0.0  ;;  %v2058_v6 = vadd.f32 %v5718_v48, %v2057_v1  ;;  %v1557_v7 = vadd.f32 %v5056_v2, %v5718_v48  ;;  %v5184_v8 = vpop.f32.mrb[10].mxu1  ;;  %v1548_v9 = vpop.f32.mrb[11].mxu0 }
  0xf9   : > { %v2674_v11 = vmax.f32 %v2066_v63, 0.0  ;;  %v2544_v12 = vmax.f32 %v1546_v0, 0.0  ;;  %v2069_v13 = vadd.f32 %v5184_v8, %v5718_v48  ;;  %v1549_v14 = vadd.f32 %v5718_v48, %v1548_v9  ;;  %v2060_v15 = vpop.f32.mrb[11].mxu1 }
  0xfa   : > { %v4665_v16 = vpack.c.bf16 %v2546_v5, %v2546_v5  ;;  %v2672_v17 = vmax.f32 %v2058_v6, 0.0  ;;  %v2547_v18 = vmax.f32 %v1557_v7, 0.0  ;;  %v2061_v19 = vadd.f32 %v5718_v48, %v2060_v15  ;;  %5162 = vmatmul.mubr.msk.bf16.gmra.mrb[116].mxu0 %vm1094_vm0, %v5433_v62  ;;  %v5441_v7 = vld [vmem:[%s5495_s22 + $0x1f8] sm:$0xff]  }
  0xfb   : > { %v4793_v20 = vpack.c.bf16 %v2674_v11, %v2674_v11  ;;  %v4663_v21 = vpack.c.bf16 %v2544_v12, %v2544_v12  ;;  %v2675_v22 = vmax.f32 %v2069_v13, 0.0  ;;  %v2545_v23 = vmax.f32 %v1549_v14, 0.0  ;;  %5290 = vmatmul.mubr.msk.bf16.gmra.mrb[116].mxu1 %vm1094_vm0, %v5434_v3  ;;  %5165 = vmatprep.mubr.msk.bf16.mxu0 %vm1094_vm0, %v5435_v4  ;;  %v5442_v12 = vld [vmem:[%s5495_s22 + $0x3f8] sm:$0xff]  }
  0xfc   : > { %3827 = vst.msk [vmem:[%s5736_s27 + $0x28] sm:$0xf] %vm3816_vm1, %v4665_v16  ;;  %v4791_v24 = vpack.c.bf16 %v2672_v17, %v2672_v17  ;;  %v4666_v25 = vpack.c.bf16 %v2547_v18, %v2547_v18  ;;  %v2673_v26 = vmax.f32 %v2061_v19, 0.0  ;;  %5293 = vmatprep.mubr.msk.bf16.mxu1 %vm1094_vm0, %v5436_v10 }
  0xfd   : > { %3955 = vst.msk [vmem:[%s5736_s27 + $0x228] sm:$0xf] %vm3816_vm1, %v4793_v20  ;;  %3825 = vst.msk [vmem:[%s5736_s27 + $0x20] sm:$0xf] %vm3816_vm1, %v4663_v21  ;;  %v4794_v27 = vpack.c.bf16 %v2675_v22, %v2675_v22  ;;  %v4664_v28 = vpack.c.bf16 %v2545_v23, %v2545_v23  ;;  %v5059_v29 = vpop.f32.mrb[12].mxu0 }
  0xfe   : > { %3953 = vst.msk [vmem:[%s5736_s27 + $0x220] sm:$0xf] %vm3816_vm1, %v4791_v24  ;;  %3828 = vst.msk [vmem:[%s5736_s27 + $0x2c] sm:$0xf] %vm3816_vm1, %v4666_v25  ;;  %v4792_v30 = vpack.c.bf16 %v2673_v26, %v2673_v26  ;;  %v1570_v31 = vadd.f32 %v5059_v29, %v5718_v48  ;;  %v5187_v32 = vpop.f32.mrb[12].mxu1  ;;  %v1561_v33 = vpop.f32.mrb[13].mxu0 }
  0xff   : > { %3956 = vst.msk [vmem:[%s5736_s27 + $0x22c] sm:$0xf] %vm3816_vm1, %v4794_v27  ;;  %3826 = vst.msk [vmem:[%s5736_s27 + $0x24] sm:$0xf] %vm3816_vm1, %v4664_v28  ;;  %v2082_v35 = vadd.f32 %v5187_v32, %v5718_v48  ;;  %v1562_v36 = vadd.f32 %v5718_v48, %v1561_v33  ;;  %v2073_v37 = vpop.f32.mrb[13].mxu1  ;;  %v5060_v38 = vpop.f32.mrb[14].mxu0 }
 0x100   : > { %3954 = vst.msk [vmem:[%s5736_s27 + $0x224] sm:$0xf] %vm3816_vm1, %v4792_v30  ;;  %v2550_v41 = vmax.f32 %v1570_v31, 0.0  ;;  %v2074_v42 = vadd.f32 %v5718_v48, %v2073_v37  ;;  %v1573_v43 = vadd.f32 %v5060_v38, %v5718_v48  ;;  %v5188_v44 = vpop.f32.mrb[14].mxu1  ;;  %v1564_v45 = vpop.f32.mrb[15].mxu0 }
 0x101   : > { %v2678_v47 = vmax.f32 %v2082_v35, 0.0  ;;  %v2548_v49 = vmax.f32 %v1562_v36, 0.0  ;;  %v2085_v50 = vadd.f32 %v5188_v44, %v5718_v48  ;;  %v1565_v51 = vadd.f32 %v5718_v48, %v1564_v45  ;;  %v2076_v52 = vpop.f32.mrb[15].mxu1 }
 0x102   : > { %v4669_v53 = vpack.c.bf16 %v2550_v41, %v2550_v41  ;;  %v2676_v54 = vmax.f32 %v2074_v42, 0.0  ;;  %v2551_v55 = vmax.f32 %v1573_v43, 0.0  ;;  %v2077_v56 = vadd.f32 %v5718_v48, %v2076_v52  ;;  %5166 = vmatmul.mubr.msk.bf16.gmra.mrb[120].mxu0 %vm1094_vm0, %v5437_v34 }
 0x103   : > { %v4797_v57 = vpack.c.bf16 %v2678_v47, %v2678_v47  ;;  %v4667_v58 = vpack.c.bf16 %v2548_v49, %v2548_v49  ;;  %v2679_v59 = vmax.f32 %v2085_v50, 0.0  ;;  %v2549_v60 = vmax.f32 %v1565_v51, 0.0  ;;  %5294 = vmatmul.mubr.msk.bf16.gmra.mrb[120].mxu1 %vm1094_vm0, %v5438_v39  ;;  %5169 = vmatprep.mubr.msk.bf16.mxu0 %vm1094_vm0, %v5439_v40 }
 0x104   : > { %3831 = vst.msk [vmem:[%s5736_s27 + $0x38] sm:$0xf] %vm3816_vm1, %v4669_v53  ;;  %v4795_v61 = vpack.c.bf16 %v2676_v54, %v2676_v54  ;;  %v4670_v62 = vpack.c.bf16 %v2551_v55, %v2551_v55  ;;  %v2677_v63 = vmax.f32 %v2077_v56, 0.0  ;;  %5297 = vmatprep.mubr.msk.bf16.mxu1 %vm1094_vm0, %v5440_v46 }
 0x105   : > { %3959 = vst.msk [vmem:[%s5736_s27 + $0x238] sm:$0xf] %vm3816_vm1, %v4797_v57  ;;  %3829 = vst.msk [vmem:[%s5736_s27 + $0x30] sm:$0xf] %vm3816_vm1, %v4667_v58  ;;  %v4798_v0 = vpack.c.bf16 %v2679_v59, %v2679_v59  ;;  %v4668_v1 = vpack.c.bf16 %v2549_v60, %v2549_v60  ;;  %v5063_v2 = vpop.f32.mrb[16].mxu0 }
 0x106   : > { %3957 = vst.msk [vmem:[%s5736_s27 + $0x230] sm:$0xf] %vm3816_vm1, %v4795_v61  ;;  %3832 = vst.msk [vmem:[%s5736_s27 + $0x3c] sm:$0xf] %vm3816_vm1, %v4670_v62  ;;  %v4796_v3 = vpack.c.bf16 %v2677_v63, %v2677_v63  ;;  %v1586_v4 = vadd.f32 %v5063_v2, %v5718_v48  ;;  %v5191_v5 = vpop.f32.mrb[16].mxu1  ;;  %v1577_v6 = vpop.f32.mrb[17].mxu0 }
 0x107   : > { %3960 = vst.msk [vmem:[%s5736_s27 + $0x23c] sm:$0xf] %vm3816_vm1, %v4798_v0  ;;  %3830 = vst.msk [vmem:[%s5736_s27 + $0x34] sm:$0xf] %vm3816_vm1, %v4668_v1  ;;  %v2098_v8 = vadd.f32 %v5191_v5, %v5718_v48  ;;  %v1578_v9 = vadd.f32 %v5718_v48, %v1577_v6  ;;  %v2089_v10 = vpop.f32.mrb[17].mxu1  ;;  %v5064_v11 = vpop.f32.mrb[18].mxu0 }
 0x108   : > { %3958 = vst.msk [vmem:[%s5736_s27 + $0x234] sm:$0xf] %vm3816_vm1, %v4796_v3  ;;  %v2554_v13 = vmax.f32 %v1586_v4, 0.0  ;;  %v2090_v14 = vadd.f32 %v5718_v48, %v2089_v10  ;;  %v1589_v15 = vadd.f32 %v5064_v11, %v5718_v48  ;;  %v5192_v16 = vpop.f32.mrb[18].mxu1  ;;  %v1580_v17 = vpop.f32.mrb[19].mxu0 }
 0x109   : > { %v2682_v18 = vmax.f32 %v2098_v8, 0.0  ;;  %v2552_v19 = vmax.f32 %v1578_v9, 0.0  ;;  %v2101_v20 = vadd.f32 %v5192_v16, %v5718_v48  ;;  %v1581_v21 = vadd.f32 %v5718_v48, %v1580_v17  ;;  %v2092_v22 = vpop.f32.mrb[19].mxu1 }
 0x10a   : > { %v4673_v23 = vpack.c.bf16 %v2554_v13, %v2554_v13  ;;  %v2680_v24 = vmax.f32 %v2090_v14, 0.0  ;;  %v2555_v25 = vmax.f32 %v1589_v15, 0.0  ;;  %v2093_v26 = vadd.f32 %v5718_v48, %v2092_v22  ;;  %5170 = vmatmul.mubr.msk.bf16.gmra.mrb[124].mxu0 %vm1094_vm0, %v5441_v7 }
 0x10b   : > { %v4801_v27 = vpack.c.bf16 %v2682_v18, %v2682_v18  ;;  %v4671_v28 = vpack.c.bf16 %v2552_v19, %v2552_v19  ;;  %v2683_v29 = vmax.f32 %v2101_v20, 0.0  ;;  %v2553_v30 = vmax.f32 %v1581_v21, 0.0  ;;  %5298 = vmatmul.mubr.msk.bf16.gmra.mrb[124].mxu1 %vm1094_vm0, %v5442_v12 }
 0x10c   : > { %3835 = vst.msk [vmem:[%s5736_s27 + $0x48] sm:$0xf] %vm3816_vm1, %v4673_v23  ;;  %v4799_v31 = vpack.c.bf16 %v2680_v24, %v2680_v24  ;;  %v4674_v32 = vpack.c.bf16 %v2555_v25, %v2555_v25  ;;  %v2681_v33 = vmax.f32 %v2093_v26, 0.0 }
 0x10d   : > { %3963 = vst.msk [vmem:[%s5736_s27 + $0x248] sm:$0xf] %vm3816_vm1, %v4801_v27  ;;  %3833 = vst.msk [vmem:[%s5736_s27 + $0x40] sm:$0xf] %vm3816_vm1, %v4671_v28  ;;  %v4802_v34 = vpack.c.bf16 %v2683_v29, %v2683_v29  ;;  %v4672_v35 = vpack.c.bf16 %v2553_v30, %v2553_v30  ;;  %v5067_v36 = vpop.f32.mrb[20].mxu0 }
 0x10e   : > { %3961 = vst.msk [vmem:[%s5736_s27 + $0x240] sm:$0xf] %vm3816_vm1, %v4799_v31  ;;  %3836 = vst.msk [vmem:[%s5736_s27 + $0x4c] sm:$0xf] %vm3816_vm1, %v4674_v32  ;;  %v4800_v37 = vpack.c.bf16 %v2681_v33, %v2681_v33  ;;  %v1602_v38 = vadd.f32 %v5067_v36, %v5718_v48  ;;  %v5195_v39 = vpop.f32.mrb[20].mxu1  ;;  %v1593_v40 = vpop.f32.mrb[21].mxu0 }
 0x10f   : > { %3964 = vst.msk [vmem:[%s5736_s27 + $0x24c] sm:$0xf] %vm3816_vm1, %v4802_v34  ;;  %3834 = vst.msk [vmem:[%s5736_s27 + $0x44] sm:$0xf] %vm3816_vm1, %v4672_v35  ;;  %v2114_v41 = vadd.f32 %v5195_v39, %v5718_v48  ;;  %v1594_v42 = vadd.f32 %v5718_v48, %v1593_v40  ;;  %v2105_v43 = vpop.f32.mrb[21].mxu1  ;;  %v5068_v44 = vpop.f32.mrb[22].mxu0 }
 0x110   : > { %3962 = vst.msk [vmem:[%s5736_s27 + $0x244] sm:$0xf] %vm3816_vm1, %v4800_v37  ;;  %v2558_v45 = vmax.f32 %v1602_v38, 0.0  ;;  %v2106_v46 = vadd.f32 %v5718_v48, %v2105_v43  ;;  %v1605_v47 = vadd.f32 %v5068_v44, %v5718_v48  ;;  %v5196_v49 = vpop.f32.mrb[22].mxu1  ;;  %v1596_v50 = vpop.f32.mrb[23].mxu0 }
 0x111   : > { %v2686_v51 = vmax.f32 %v2114_v41, 0.0  ;;  %v2556_v52 = vmax.f32 %v1594_v42, 0.0  ;;  %v2117_v53 = vadd.f32 %v5196_v49, %v5718_v48  ;;  %v1597_v54 = vadd.f32 %v5718_v48, %v1596_v50  ;;  %v2108_v55 = vpop.f32.mrb[23].mxu1 }
 0x112   : > { %v4677_v56 = vpack.c.bf16 %v2558_v45, %v2558_v45  ;;  %v2684_v57 = vmax.f32 %v2106_v46, 0.0  ;;  %v2559_v58 = vmax.f32 %v1605_v47, 0.0  ;;  %v2109_v59 = vadd.f32 %v5718_v48, %v2108_v55 }
 0x113   : > { %v4805_v60 = vpack.c.bf16 %v2686_v51, %v2686_v51  ;;  %v4675_v61 = vpack.c.bf16 %v2556_v52, %v2556_v52  ;;  %v2687_v62 = vmax.f32 %v2117_v53, 0.0  ;;  %v2557_v63 = vmax.f32 %v1597_v54, 0.0 }
 0x114   : > { %3839 = vst.msk [vmem:[%s5736_s27 + $0x58] sm:$0xf] %vm3816_vm1, %v4677_v56  ;;  %v4803_v0 = vpack.c.bf16 %v2684_v57, %v2684_v57  ;;  %v4678_v1 = vpack.c.bf16 %v2559_v58, %v2559_v58  ;;  %v2685_v2 = vmax.f32 %v2109_v59, 0.0 }
 0x115   : > { %3967 = vst.msk [vmem:[%s5736_s27 + $0x258] sm:$0xf] %vm3816_vm1, %v4805_v60  ;;  %3837 = vst.msk [vmem:[%s5736_s27 + $0x50] sm:$0xf] %vm3816_vm1, %v4675_v61  ;;  %v4806_v3 = vpack.c.bf16 %v2687_v62, %v2687_v62  ;;  %v4676_v4 = vpack.c.bf16 %v2557_v63, %v2557_v63  ;;  %v5071_v5 = vpop.f32.mrb[24].mxu0 }
 0x116   : > { %3965 = vst.msk [vmem:[%s5736_s27 + $0x250] sm:$0xf] %vm3816_vm1, %v4803_v0  ;;  %3840 = vst.msk [vmem:[%s5736_s27 + $0x5c] sm:$0xf] %vm3816_vm1, %v4678_v1  ;;  %v4804_v6 = vpack.c.bf16 %v2685_v2, %v2685_v2  ;;  %v1618_v7 = vadd.f32 %v5071_v5, %v5718_v48  ;;  %v5199_v8 = vpop.f32.mrb[24].mxu1  ;;  %v1609_v9 = vpop.f32.mrb[25].mxu0 }
 0x117   : > { %3968 = vst.msk [vmem:[%s5736_s27 + $0x25c] sm:$0xf] %vm3816_vm1, %v4806_v3  ;;  %3838 = vst.msk [vmem:[%s5736_s27 + $0x54] sm:$0xf] %vm3816_vm1, %v4676_v4  ;;  %v2130_v10 = vadd.f32 %v5199_v8, %v5718_v48  ;;  %v1610_v11 = vadd.f32 %v5718_v48, %v1609_v9  ;;  %v2121_v12 = vpop.f32.mrb[25].mxu1  ;;  %v5072_v13 = vpop.f32.mrb[26].mxu0 }
 0x118   : > { %3966 = vst.msk [vmem:[%s5736_s27 + $0x254] sm:$0xf] %vm3816_vm1, %v4804_v6  ;;  %v2562_v14 = vmax.f32 %v1618_v7, 0.0  ;;  %v2122_v15 = vadd.f32 %v5718_v48, %v2121_v12  ;;  %v1621_v16 = vadd.f32 %v5072_v13, %v5718_v48  ;;  %v5200_v17 = vpop.f32.mrb[26].mxu1  ;;  %v1612_v18 = vpop.f32.mrb[27].mxu0 }
 0x119   : > { %v2690_v19 = vmax.f32 %v2130_v10, 0.0  ;;  %v2560_v20 = vmax.f32 %v1610_v11, 0.0  ;;  %v2133_v21 = vadd.f32 %v5200_v17, %v5718_v48  ;;  %v1613_v22 = vadd.f32 %v5718_v48, %v1612_v18  ;;  %v2124_v23 = vpop.f32.mrb[27].mxu1 }
 0x11a   : > { %v4681_v24 = vpack.c.bf16 %v2562_v14, %v2562_v14  ;;  %v2688_v25 = vmax.f32 %v2122_v15, 0.0  ;;  %v2563_v26 = vmax.f32 %v1621_v16, 0.0  ;;  %v2125_v27 = vadd.f32 %v5718_v48, %v2124_v23 }
 0x11b   : > { %v4809_v28 = vpack.c.bf16 %v2690_v19, %v2690_v19  ;;  %v4679_v29 = vpack.c.bf16 %v2560_v20, %v2560_v20  ;;  %v2691_v30 = vmax.f32 %v2133_v21, 0.0  ;;  %v2561_v31 = vmax.f32 %v1613_v22, 0.0 }
 0x11c   : > { %3843 = vst.msk [vmem:[%s5736_s27 + $0x68] sm:$0xf] %vm3816_vm1, %v4681_v24  ;;  %v4807_v32 = vpack.c.bf16 %v2688_v25, %v2688_v25  ;;  %v4682_v33 = vpack.c.bf16 %v2563_v26, %v2563_v26  ;;  %v2689_v34 = vmax.f32 %v2125_v27, 0.0 }
 0x11d   : > { %3971 = vst.msk [vmem:[%s5736_s27 + $0x268] sm:$0xf] %vm3816_vm1, %v4809_v28  ;;  %3841 = vst.msk [vmem:[%s5736_s27 + $0x60] sm:$0xf] %vm3816_vm1, %v4679_v29  ;;  %v4810_v35 = vpack.c.bf16 %v2691_v30, %v2691_v30  ;;  %v4680_v36 = vpack.c.bf16 %v2561_v31, %v2561_v31  ;;  %v5075_v37 = vpop.f32.mrb[28].mxu0 }
 0x11e   : > { %3969 = vst.msk [vmem:[%s5736_s27 + $0x260] sm:$0xf] %vm3816_vm1, %v4807_v32  ;;  %3844 = vst.msk [vmem:[%s5736_s27 + $0x6c] sm:$0xf] %vm3816_vm1, %v4682_v33  ;;  %v4808_v38 = vpack.c.bf16 %v2689_v34, %v2689_v34  ;;  %v1634_v39 = vadd.f32 %v5075_v37, %v5718_v48  ;;  %v5203_v40 = vpop.f32.mrb[28].mxu1  ;;  %v1625_v41 = vpop.f32.mrb[29].mxu0 }
 0x11f   : > { %3972 = vst.msk [vmem:[%s5736_s27 + $0x26c] sm:$0xf] %vm3816_vm1, %v4810_v35  ;;  %3842 = vst.msk [vmem:[%s5736_s27 + $0x64] sm:$0xf] %vm3816_vm1, %v4680_v36  ;;  %v2146_v42 = vadd.f32 %v5203_v40, %v5718_v48  ;;  %v1626_v43 = vadd.f32 %v5718_v48, %v1625_v41  ;;  %v2137_v44 = vpop.f32.mrb[29].mxu1  ;;  %v5076_v45 = vpop.f32.mrb[30].mxu0 }
 0x120   : > { %3970 = vst.msk [vmem:[%s5736_s27 + $0x264] sm:$0xf] %vm3816_vm1, %v4808_v38  ;;  %v2566_v46 = vmax.f32 %v1634_v39, 0.0  ;;  %v2138_v47 = vadd.f32 %v5718_v48, %v2137_v44  ;;  %v1637_v49 = vadd.f32 %v5076_v45, %v5718_v48  ;;  %v5204_v50 = vpop.f32.mrb[30].mxu1  ;;  %v1628_v51 = vpop.f32.mrb[31].mxu0 }
 0x121   : > { %v2694_v52 = vmax.f32 %v2146_v42, 0.0  ;;  %v2564_v53 = vmax.f32 %v1626_v43, 0.0  ;;  %v2149_v54 = vadd.f32 %v5204_v50, %v5718_v48  ;;  %v1629_v55 = vadd.f32 %v5718_v48, %v1628_v51  ;;  %v2140_v56 = vpop.f32.mrb[31].mxu1 }
 0x122   : > { %v4685_v57 = vpack.c.bf16 %v2566_v46, %v2566_v46  ;;  %v2692_v58 = vmax.f32 %v2138_v47, 0.0  ;;  %v2567_v59 = vmax.f32 %v1637_v49, 0.0  ;;  %v2141_v60 = vadd.f32 %v5718_v48, %v2140_v56 }
 0x123   : > { %v4813_v61 = vpack.c.bf16 %v2694_v52, %v2694_v52  ;;  %v4683_v62 = vpack.c.bf16 %v2564_v53, %v2564_v53  ;;  %v2695_v63 = vmax.f32 %v2149_v54, 0.0  ;;  %v2565_v0 = vmax.f32 %v1629_v55, 0.0 }
 0x124   : > { %3847 = vst.msk [vmem:[%s5736_s27 + $0x78] sm:$0xf] %vm3816_vm1, %v4685_v57  ;;  %v4811_v1 = vpack.c.bf16 %v2692_v58, %v2692_v58  ;;  %v4686_v2 = vpack.c.bf16 %v2567_v59, %v2567_v59  ;;  %v2693_v3 = vmax.f32 %v2141_v60, 0.0 }
 0x125   : > { %3975 = vst.msk [vmem:[%s5736_s27 + $0x278] sm:$0xf] %vm3816_vm1, %v4813_v61  ;;  %3845 = vst.msk [vmem:[%s5736_s27 + $0x70] sm:$0xf] %vm3816_vm1, %v4683_v62  ;;  %v4814_v4 = vpack.c.bf16 %v2695_v63, %v2695_v63  ;;  %v4684_v5 = vpack.c.bf16 %v2565_v0, %v2565_v0  ;;  %v5079_v6 = vpop.f32.mrb[32].mxu0 }
 0x126   : > { %3973 = vst.msk [vmem:[%s5736_s27 + $0x270] sm:$0xf] %vm3816_vm1, %v4811_v1  ;;  %3848 = vst.msk [vmem:[%s5736_s27 + $0x7c] sm:$0xf] %vm3816_vm1, %v4686_v2  ;;  %v4812_v7 = vpack.c.bf16 %v2693_v3, %v2693_v3  ;;  %v1650_v8 = vadd.f32 %v5079_v6, %v5718_v48  ;;  %v5207_v9 = vpop.f32.mrb[32].mxu1  ;;  %v1641_v10 = vpop.f32.mrb[33].mxu0 }
 0x127   : > { %3976 = vst.msk [vmem:[%s5736_s27 + $0x27c] sm:$0xf] %vm3816_vm1, %v4814_v4  ;;  %3846 = vst.msk [vmem:[%s5736_s27 + $0x74] sm:$0xf] %vm3816_vm1, %v4684_v5  ;;  %v2162_v11 = vadd.f32 %v5207_v9, %v5718_v48  ;;  %v1642_v12 = vadd.f32 %v5718_v48, %v1641_v10  ;;  %v2153_v13 = vpop.f32.mrb[33].mxu1  ;;  %v5080_v14 = vpop.f32.mrb[34].mxu0 }
 0x128   : > { %3974 = vst.msk [vmem:[%s5736_s27 + $0x274] sm:$0xf] %vm3816_vm1, %v4812_v7  ;;  %v2570_v15 = vmax.f32 %v1650_v8, 0.0  ;;  %v2154_v16 = vadd.f32 %v5718_v48, %v2153_v13  ;;  %v1653_v17 = vadd.f32 %v5080_v14, %v5718_v48  ;;  %v5208_v18 = vpop.f32.mrb[34].mxu1  ;;  %v1644_v19 = vpop.f32.mrb[35].mxu0 }
 0x129   : > { %v2698_v20 = vmax.f32 %v2162_v11, 0.0  ;;  %v2568_v21 = vmax.f32 %v1642_v12, 0.0  ;;  %v2165_v22 = vadd.f32 %v5208_v18, %v5718_v48  ;;  %v1645_v23 = vadd.f32 %v5718_v48, %v1644_v19  ;;  %v2156_v24 = vpop.f32.mrb[35].mxu1 }
 0x12a   : > { %v4689_v25 = vpack.c.bf16 %v2570_v15, %v2570_v15  ;;  %v2696_v26 = vmax.f32 %v2154_v16, 0.0  ;;  %v2571_v27 = vmax.f32 %v1653_v17, 0.0  ;;  %v2157_v28 = vadd.f32 %v5718_v48, %v2156_v24 }
 0x12b   : > { %v4817_v29 = vpack.c.bf16 %v2698_v20, %v2698_v20  ;;  %v4687_v30 = vpack.c.bf16 %v2568_v21, %v2568_v21  ;;  %v2699_v31 = vmax.f32 %v2165_v22, 0.0  ;;  %v2569_v32 = vmax.f32 %v1645_v23, 0.0 }
 0x12c   : > { %3851 = vst.msk [vmem:[%s5736_s27 + $0x88] sm:$0xf] %vm3816_vm1, %v4689_v25  ;;  %v4815_v33 = vpack.c.bf16 %v2696_v26, %v2696_v26  ;;  %v4690_v34 = vpack.c.bf16 %v2571_v27, %v2571_v27  ;;  %v2697_v35 = vmax.f32 %v2157_v28, 0.0 }
 0x12d   : > { %3979 = vst.msk [vmem:[%s5736_s27 + $0x288] sm:$0xf] %vm3816_vm1, %v4817_v29  ;;  %3849 = vst.msk [vmem:[%s5736_s27 + $0x80] sm:$0xf] %vm3816_vm1, %v4687_v30  ;;  %v4818_v36 = vpack.c.bf16 %v2699_v31, %v2699_v31  ;;  %v4688_v37 = vpack.c.bf16 %v2569_v32, %v2569_v32  ;;  %v5083_v38 = vpop.f32.mrb[36].mxu0 }
 0x12e   : > { %3977 = vst.msk [vmem:[%s5736_s27 + $0x280] sm:$0xf] %vm3816_vm1, %v4815_v33  ;;  %3852 = vst.msk [vmem:[%s5736_s27 + $0x8c] sm:$0xf] %vm3816_vm1, %v4690_v34  ;;  %v4816_v39 = vpack.c.bf16 %v2697_v35, %v2697_v35  ;;  %v1666_v40 = vadd.f32 %v5083_v38, %v5718_v48  ;;  %v5211_v41 = vpop.f32.mrb[36].mxu1  ;;  %v1657_v42 = vpop.f32.mrb[37].mxu0 }
 0x12f   : > { %3980 = vst.msk [vmem:[%s5736_s27 + $0x28c] sm:$0xf] %vm3816_vm1, %v4818_v36  ;;  %3850 = vst.msk [vmem:[%s5736_s27 + $0x84] sm:$0xf] %vm3816_vm1, %v4688_v37  ;;  %v2178_v43 = vadd.f32 %v5211_v41, %v5718_v48  ;;  %v1658_v44 = vadd.f32 %v5718_v48, %v1657_v42  ;;  %v2169_v45 = vpop.f32.mrb[37].mxu1  ;;  %v5084_v46 = vpop.f32.mrb[38].mxu0 }
 0x130   : > { %3978 = vst.msk [vmem:[%s5736_s27 + $0x284] sm:$0xf] %vm3816_vm1, %v4816_v39  ;;  %v2574_v47 = vmax.f32 %v1666_v40, 0.0  ;;  %v2170_v49 = vadd.f32 %v5718_v48, %v2169_v45  ;;  %v1669_v50 = vadd.f32 %v5084_v46, %v5718_v48  ;;  %v5212_v51 = vpop.f32.mrb[38].mxu1  ;;  %v1660_v52 = vpop.f32.mrb[39].mxu0 }
 0x131   : > { %v2702_v53 = vmax.f32 %v2178_v43, 0.0  ;;  %v2572_v54 = vmax.f32 %v1658_v44, 0.0  ;;  %v2181_v55 = vadd.f32 %v5212_v51, %v5718_v48  ;;  %v1661_v56 = vadd.f32 %v5718_v48, %v1660_v52  ;;  %v2172_v57 = vpop.f32.mrb[39].mxu1 }
 0x132   : > { %v4693_v58 = vpack.c.bf16 %v2574_v47, %v2574_v47  ;;  %v2700_v59 = vmax.f32 %v2170_v49, 0.0  ;;  %v2575_v60 = vmax.f32 %v1669_v50, 0.0  ;;  %v2173_v61 = vadd.f32 %v5718_v48, %v2172_v57 }
 0x133   : > { %v4821_v62 = vpack.c.bf16 %v2702_v53, %v2702_v53  ;;  %v4691_v63 = vpack.c.bf16 %v2572_v54, %v2572_v54  ;;  %v2703_v0 = vmax.f32 %v2181_v55, 0.0  ;;  %v2573_v1 = vmax.f32 %v1661_v56, 0.0 }
 0x134   : > { %3855 = vst.msk [vmem:[%s5736_s27 + $0x98] sm:$0xf] %vm3816_vm1, %v4693_v58  ;;  %v4819_v2 = vpack.c.bf16 %v2700_v59, %v2700_v59  ;;  %v4694_v3 = vpack.c.bf16 %v2575_v60, %v2575_v60  ;;  %v2701_v4 = vmax.f32 %v2173_v61, 0.0 }
 0x135   : > { %3983 = vst.msk [vmem:[%s5736_s27 + $0x298] sm:$0xf] %vm3816_vm1, %v4821_v62  ;;  %3853 = vst.msk [vmem:[%s5736_s27 + $0x90] sm:$0xf] %vm3816_vm1, %v4691_v63  ;;  %v4822_v5 = vpack.c.bf16 %v2703_v0, %v2703_v0  ;;  %v4692_v6 = vpack.c.bf16 %v2573_v1, %v2573_v1  ;;  %v5087_v7 = vpop.f32.mrb[40].mxu0 }
 0x136   : > { %3981 = vst.msk [vmem:[%s5736_s27 + $0x290] sm:$0xf] %vm3816_vm1, %v4819_v2  ;;  %3856 = vst.msk [vmem:[%s5736_s27 + $0x9c] sm:$0xf] %vm3816_vm1, %v4694_v3  ;;  %v4820_v8 = vpack.c.bf16 %v2701_v4, %v2701_v4  ;;  %v1682_v9 = vadd.f32 %v5087_v7, %v5718_v48  ;;  %v5215_v10 = vpop.f32.mrb[40].mxu1  ;;  %v1673_v11 = vpop.f32.mrb[41].mxu0 }
 0x137   : > { %3984 = vst.msk [vmem:[%s5736_s27 + $0x29c] sm:$0xf] %vm3816_vm1, %v4822_v5  ;;  %3854 = vst.msk [vmem:[%s5736_s27 + $0x94] sm:$0xf] %vm3816_vm1, %v4692_v6  ;;  %v2194_v12 = vadd.f32 %v5215_v10, %v5718_v48  ;;  %v1674_v13 = vadd.f32 %v5718_v48, %v1673_v11  ;;  %v2185_v14 = vpop.f32.mrb[41].mxu1  ;;  %v5088_v15 = vpop.f32.mrb[42].mxu0 }
 0x138   : > { %3982 = vst.msk [vmem:[%s5736_s27 + $0x294] sm:$0xf] %vm3816_vm1, %v4820_v8  ;;  %v2578_v16 = vmax.f32 %v1682_v9, 0.0  ;;  %v2186_v17 = vadd.f32 %v5718_v48, %v2185_v14  ;;  %v1685_v18 = vadd.f32 %v5088_v15, %v5718_v48  ;;  %v5216_v19 = vpop.f32.mrb[42].mxu1  ;;  %v1676_v20 = vpop.f32.mrb[43].mxu0 }
 0x139   : > { %v2706_v21 = vmax.f32 %v2194_v12, 0.0  ;;  %v2576_v22 = vmax.f32 %v1674_v13, 0.0  ;;  %v2197_v23 = vadd.f32 %v5216_v19, %v5718_v48  ;;  %v1677_v24 = vadd.f32 %v5718_v48, %v1676_v20  ;;  %v2188_v25 = vpop.f32.mrb[43].mxu1  ;;  %v6050_v9 = vld [vmem:[%s6548_s2] ss:$0 sm:$0xff] }
 0x13a   : > { %v4697_v26 = vpack.c.bf16 %v2578_v16, %v2578_v16  ;;  %v2704_v27 = vmax.f32 %v2186_v17, 0.0  ;;  %v2579_v28 = vmax.f32 %v1685_v18, 0.0  ;;  %v2189_v29 = vadd.f32 %v5718_v48, %v2188_v25 }
 0x13b   : > { %v4825_v30 = vpack.c.bf16 %v2706_v21, %v2706_v21  ;;  %v4695_v31 = vpack.c.bf16 %v2576_v22, %v2576_v22  ;;  %v2707_v32 = vmax.f32 %v2197_v23, 0.0  ;;  %v2577_v33 = vmax.f32 %v1677_v24, 0.0 }
 0x13c   : > { %3859 = vst.msk [vmem:[%s5736_s27 + $0xa8] sm:$0xf] %vm3816_vm1, %v4697_v26  ;;  %v4823_v34 = vpack.c.bf16 %v2704_v27, %v2704_v27  ;;  %v4698_v35 = vpack.c.bf16 %v2579_v28, %v2579_v28  ;;  %v2705_v36 = vmax.f32 %v2189_v29, 0.0 }
 0x13d   : > { %3987 = vst.msk [vmem:[%s5736_s27 + $0x2a8] sm:$0xf] %vm3816_vm1, %v4825_v30  ;;  %3857 = vst.msk [vmem:[%s5736_s27 + $0xa0] sm:$0xf] %vm3816_vm1, %v4695_v31  ;;  %v4826_v37 = vpack.c.bf16 %v2707_v32, %v2707_v32  ;;  %v4696_v38 = vpack.c.bf16 %v2577_v33, %v2577_v33  ;;  %v5091_v39 = vpop.f32.mrb[44].mxu0 }
 0x13e   : > { %3985 = vst.msk [vmem:[%s5736_s27 + $0x2a0] sm:$0xf] %vm3816_vm1, %v4823_v34  ;;  %3860 = vst.msk [vmem:[%s5736_s27 + $0xac] sm:$0xf] %vm3816_vm1, %v4698_v35  ;;  %v4824_v40 = vpack.c.bf16 %v2705_v36, %v2705_v36  ;;  %v1698_v41 = vadd.f32 %v5091_v39, %v5718_v48  ;;  %v5219_v42 = vpop.f32.mrb[44].mxu1  ;;  %v1689_v43 = vpop.f32.mrb[45].mxu0 }
 0x13f   : > { %3988 = vst.msk [vmem:[%s5736_s27 + $0x2ac] sm:$0xf] %vm3816_vm1, %v4826_v37  ;;  %3858 = vst.msk [vmem:[%s5736_s27 + $0xa4] sm:$0xf] %vm3816_vm1, %v4696_v38  ;;  %v2210_v44 = vadd.f32 %v5219_v42, %v5718_v48  ;;  %v1690_v45 = vadd.f32 %v5718_v48, %v1689_v43  ;;  %v2201_v46 = vpop.f32.mrb[45].mxu1  ;;  %v5092_v47 = vpop.f32.mrb[46].mxu0 }
 0x140   : > { %3986 = vst.msk [vmem:[%s5736_s27 + $0x2a4] sm:$0xf] %vm3816_vm1, %v4824_v40  ;;  %v2582_v49 = vmax.f32 %v1698_v41, 0.0  ;;  %v2202_v50 = vadd.f32 %v5718_v48, %v2201_v46  ;;  %v1701_v51 = vadd.f32 %v5092_v47, %v5718_v48  ;;  %v5220_v52 = vpop.f32.mrb[46].mxu1  ;;  %v1692_v53 = vpop.f32.mrb[47].mxu0 }
 0x141   : > { %v2710_v54 = vmax.f32 %v2210_v44, 0.0  ;;  %v2580_v55 = vmax.f32 %v1690_v45, 0.0  ;;  %v2213_v56 = vadd.f32 %v5220_v52, %v5718_v48  ;;  %v1693_v57 = vadd.f32 %v5718_v48, %v1692_v53  ;;  %v2204_v58 = vpop.f32.mrb[47].mxu1 }
 0x142   : > { %v4701_v59 = vpack.c.bf16 %v2582_v49, %v2582_v49  ;;  %v2708_v60 = vmax.f32 %v2202_v50, 0.0  ;;  %v2583_v61 = vmax.f32 %v1701_v51, 0.0  ;;  %v2205_v62 = vadd.f32 %v5718_v48, %v2204_v58 }
 0x143   : > { %v4829_v63 = vpack.c.bf16 %v2710_v54, %v2710_v54  ;;  %v4699_v0 = vpack.c.bf16 %v2580_v55, %v2580_v55  ;;  %v2711_v1 = vmax.f32 %v2213_v56, 0.0  ;;  %v2581_v2 = vmax.f32 %v1693_v57, 0.0 }
 0x144   : > { %3863 = vst.msk [vmem:[%s5736_s27 + $0xb8] sm:$0xf] %vm3816_vm1, %v4701_v59  ;;  %v4827_v3 = vpack.c.bf16 %v2708_v60, %v2708_v60  ;;  %v4702_v4 = vpack.c.bf16 %v2583_v61, %v2583_v61  ;;  %v2709_v5 = vmax.f32 %v2205_v62, 0.0 }
 0x145   : > { %3991 = vst.msk [vmem:[%s5736_s27 + $0x2b8] sm:$0xf] %vm3816_vm1, %v4829_v63  ;;  %3861 = vst.msk [vmem:[%s5736_s27 + $0xb0] sm:$0xf] %vm3816_vm1, %v4699_v0  ;;  %v4830_v6 = vpack.c.bf16 %v2711_v1, %v2711_v1  ;;  %v4700_v7 = vpack.c.bf16 %v2581_v2, %v2581_v2  ;;  %v5095_v8 = vpop.f32.mrb[48].mxu0 }
 0x146   : > { %3989 = vst.msk [vmem:[%s5736_s27 + $0x2b0] sm:$0xf] %vm3816_vm1, %v4827_v3  ;;  %3864 = vst.msk [vmem:[%s5736_s27 + $0xbc] sm:$0xf] %vm3816_vm1, %v4702_v4  ;;  %v4828_v48 = vpack.c.bf16 %v2709_v5, %v2709_v5  ;;  %v1714_v10 = vadd.f32 %v6050_v9, %v5095_v8  ;;  %v5223_v11 = vpop.f32.mrb[48].mxu1  ;;  %v1705_v12 = vpop.f32.mrb[49].mxu0 }
 0x147   : > { %3992 = vst.msk [vmem:[%s5736_s27 + $0x2bc] sm:$0xf] %vm3816_vm1, %v4830_v6  ;;  %3862 = vst.msk [vmem:[%s5736_s27 + $0xb4] sm:$0xf] %vm3816_vm1, %v4700_v7  ;;  %v2226_v13 = vadd.f32 %v6050_v9, %v5223_v11  ;;  %v1706_v14 = vadd.f32 %v6050_v9, %v1705_v12  ;;  %v2217_v15 = vpop.f32.mrb[49].mxu1  ;;  %v5096_v16 = vpop.f32.mrb[50].mxu0 }
 0x148   : > { %3990 = vst.msk [vmem:[%s5736_s27 + $0x2b4] sm:$0xf] %vm3816_vm1, %v4828_v48  ;;  %v2586_v17 = vmax.f32 %v1714_v10, 0.0  ;;  %v2218_v18 = vadd.f32 %v6050_v9, %v2217_v15  ;;  %v1717_v19 = vadd.f32 %v6050_v9, %v5096_v16  ;;  %v5224_v20 = vpop.f32.mrb[50].mxu1  ;;  %v1708_v21 = vpop.f32.mrb[51].mxu0 }
 0x149   : > { %v2714_v22 = vmax.f32 %v2226_v13, 0.0  ;;  %v2584_v23 = vmax.f32 %v1706_v14, 0.0  ;;  %v2229_v24 = vadd.f32 %v6050_v9, %v5224_v20  ;;  %v1709_v25 = vadd.f32 %v6050_v9, %v1708_v21  ;;  %v2220_v26 = vpop.f32.mrb[51].mxu1 }
 0x14a   : > { %v4705_v27 = vpack.c.bf16 %v2586_v17, %v2586_v17  ;;  %v2712_v28 = vmax.f32 %v2218_v18, 0.0  ;;  %v2587_v29 = vmax.f32 %v1717_v19, 0.0  ;;  %v2221_v30 = vadd.f32 %v6050_v9, %v2220_v26 }
 0x14b   : > { %v4833_v31 = vpack.c.bf16 %v2714_v22, %v2714_v22  ;;  %v4703_v32 = vpack.c.bf16 %v2584_v23, %v2584_v23  ;;  %v2715_v33 = vmax.f32 %v2229_v24, 0.0  ;;  %v2585_v34 = vmax.f32 %v1709_v25, 0.0 }
 0x14c   : > { %3867 = vst.msk [vmem:[%s5736_s27 + $0xc8] sm:$0xf] %vm3816_vm1, %v4705_v27  ;;  %v4831_v35 = vpack.c.bf16 %v2712_v28, %v2712_v28  ;;  %v4706_v36 = vpack.c.bf16 %v2587_v29, %v2587_v29  ;;  %v2713_v37 = vmax.f32 %v2221_v30, 0.0 }
 0x14d   : > { %3995 = vst.msk [vmem:[%s5736_s27 + $0x2c8] sm:$0xf] %vm3816_vm1, %v4833_v31  ;;  %3865 = vst.msk [vmem:[%s5736_s27 + $0xc0] sm:$0xf] %vm3816_vm1, %v4703_v32  ;;  %v4834_v38 = vpack.c.bf16 %v2715_v33, %v2715_v33  ;;  %v4704_v39 = vpack.c.bf16 %v2585_v34, %v2585_v34  ;;  %v5099_v40 = vpop.f32.mrb[52].mxu0 }
 0x14e   : > { %3993 = vst.msk [vmem:[%s5736_s27 + $0x2c0] sm:$0xf] %vm3816_vm1, %v4831_v35  ;;  %3868 = vst.msk [vmem:[%s5736_s27 + $0xcc] sm:$0xf] %vm3816_vm1, %v4706_v36  ;;  %v4832_v41 = vpack.c.bf16 %v2713_v37, %v2713_v37  ;;  %v1730_v42 = vadd.f32 %v6050_v9, %v5099_v40  ;;  %v5227_v43 = vpop.f32.mrb[52].mxu1  ;;  %v1721_v44 = vpop.f32.mrb[53].mxu0 }
 0x14f   : > { %3996 = vst.msk [vmem:[%s5736_s27 + $0x2cc] sm:$0xf] %vm3816_vm1, %v4834_v38  ;;  %3866 = vst.msk [vmem:[%s5736_s27 + $0xc4] sm:$0xf] %vm3816_vm1, %v4704_v39  ;;  %v2242_v45 = vadd.f32 %v6050_v9, %v5227_v43  ;;  %v1722_v46 = vadd.f32 %v6050_v9, %v1721_v44  ;;  %v2233_v47 = vpop.f32.mrb[53].mxu1  ;;  %v5100_v49 = vpop.f32.mrb[54].mxu0 }
 0x150   : > { %3994 = vst.msk [vmem:[%s5736_s27 + $0x2c4] sm:$0xf] %vm3816_vm1, %v4832_v41  ;;  %v2590_v50 = vmax.f32 %v1730_v42, 0.0  ;;  %v2234_v51 = vadd.f32 %v6050_v9, %v2233_v47  ;;  %v1733_v52 = vadd.f32 %v6050_v9, %v5100_v49  ;;  %v5228_v53 = vpop.f32.mrb[54].mxu1  ;;  %v1724_v54 = vpop.f32.mrb[55].mxu0 }
 0x151   : > { %v2718_v55 = vmax.f32 %v2242_v45, 0.0  ;;  %v2588_v56 = vmax.f32 %v1722_v46, 0.0  ;;  %v2245_v57 = vadd.f32 %v6050_v9, %v5228_v53  ;;  %v1725_v58 = vadd.f32 %v6050_v9, %v1724_v54  ;;  %v2236_v59 = vpop.f32.mrb[55].mxu1 }
 0x152   : > { %v4709_v60 = vpack.c.bf16 %v2590_v50, %v2590_v50  ;;  %v2716_v61 = vmax.f32 %v2234_v51, 0.0  ;;  %v2591_v62 = vmax.f32 %v1733_v52, 0.0  ;;  %v2237_v63 = vadd.f32 %v6050_v9, %v2236_v59 }
 0x153   : > { %v4837_v0 = vpack.c.bf16 %v2718_v55, %v2718_v55  ;;  %v4707_v1 = vpack.c.bf16 %v2588_v56, %v2588_v56  ;;  %v2719_v2 = vmax.f32 %v2245_v57, 0.0  ;;  %v2589_v3 = vmax.f32 %v1725_v58, 0.0 }
 0x154   : > { %3871 = vst.msk [vmem:[%s5736_s27 + $0xd8] sm:$0xf] %vm3816_vm1, %v4709_v60  ;;  %v4835_v4 = vpack.c.bf16 %v2716_v61, %v2716_v61  ;;  %v4710_v5 = vpack.c.bf16 %v2591_v62, %v2591_v62  ;;  %v2717_v6 = vmax.f32 %v2237_v63, 0.0 }
 0x155   : > { %3999 = vst.msk [vmem:[%s5736_s27 + $0x2d8] sm:$0xf] %vm3816_vm1, %v4837_v0  ;;  %3869 = vst.msk [vmem:[%s5736_s27 + $0xd0] sm:$0xf] %vm3816_vm1, %v4707_v1  ;;  %v4838_v7 = vpack.c.bf16 %v2719_v2, %v2719_v2  ;;  %v4708_v8 = vpack.c.bf16 %v2589_v3, %v2589_v3  ;;  %v5103_v48 = vpop.f32.mrb[56].mxu0 }
 0x156   : > { %3997 = vst.msk [vmem:[%s5736_s27 + $0x2d0] sm:$0xf] %vm3816_vm1, %v4835_v4  ;;  %3872 = vst.msk [vmem:[%s5736_s27 + $0xdc] sm:$0xf] %vm3816_vm1, %v4710_v5  ;;  %v4836_v10 = vpack.c.bf16 %v2717_v6, %v2717_v6  ;;  %v1746_v11 = vadd.f32 %v6050_v9, %v5103_v48  ;;  %v5231_v12 = vpop.f32.mrb[56].mxu1  ;;  %v1737_v13 = vpop.f32.mrb[57].mxu0 }
 0x157   : > { %4000 = vst.msk [vmem:[%s5736_s27 + $0x2dc] sm:$0xf] %vm3816_vm1, %v4838_v7  ;;  %3870 = vst.msk [vmem:[%s5736_s27 + $0xd4] sm:$0xf] %vm3816_vm1, %v4708_v8  ;;  %v2258_v14 = vadd.f32 %v6050_v9, %v5231_v12  ;;  %v1738_v15 = vadd.f32 %v6050_v9, %v1737_v13  ;;  %v2249_v16 = vpop.f32.mrb[57].mxu1  ;;  %v5104_v17 = vpop.f32.mrb[58].mxu0 }
 0x158   : > { %3998 = vst.msk [vmem:[%s5736_s27 + $0x2d4] sm:$0xf] %vm3816_vm1, %v4836_v10  ;;  %v2594_v18 = vmax.f32 %v1746_v11, 0.0  ;;  %v2250_v19 = vadd.f32 %v6050_v9, %v2249_v16  ;;  %v1749_v20 = vadd.f32 %v6050_v9, %v5104_v17  ;;  %v5232_v21 = vpop.f32.mrb[58].mxu1  ;;  %v1740_v22 = vpop.f32.mrb[59].mxu0 }
 0x159   : > { %v2722_v23 = vmax.f32 %v2258_v14, 0.0  ;;  %v2592_v24 = vmax.f32 %v1738_v15, 0.0  ;;  %v2261_v25 = vadd.f32 %v6050_v9, %v5232_v21  ;;  %v1741_v26 = vadd.f32 %v6050_v9, %v1740_v22  ;;  %v2252_v27 = vpop.f32.mrb[59].mxu1 }
 0x15a   : > { %v4713_v28 = vpack.c.bf16 %v2594_v18, %v2594_v18  ;;  %v2720_v29 = vmax.f32 %v2250_v19, 0.0  ;;  %v2595_v30 = vmax.f32 %v1749_v20, 0.0  ;;  %v2253_v31 = vadd.f32 %v6050_v9, %v2252_v27 }
 0x15b   : > { %v4841_v32 = vpack.c.bf16 %v2722_v23, %v2722_v23  ;;  %v4711_v33 = vpack.c.bf16 %v2592_v24, %v2592_v24  ;;  %v2723_v34 = vmax.f32 %v2261_v25, 0.0  ;;  %v2593_v35 = vmax.f32 %v1741_v26, 0.0 }
 0x15c   : > { %3875 = vst.msk [vmem:[%s5736_s27 + $0xe8] sm:$0xf] %vm3816_vm1, %v4713_v28  ;;  %v4839_v36 = vpack.c.bf16 %v2720_v29, %v2720_v29  ;;  %v4714_v37 = vpack.c.bf16 %v2595_v30, %v2595_v30  ;;  %v2721_v38 = vmax.f32 %v2253_v31, 0.0 }
 0x15d   : > { %4003 = vst.msk [vmem:[%s5736_s27 + $0x2e8] sm:$0xf] %vm3816_vm1, %v4841_v32  ;;  %3873 = vst.msk [vmem:[%s5736_s27 + $0xe0] sm:$0xf] %vm3816_vm1, %v4711_v33  ;;  %v4842_v39 = vpack.c.bf16 %v2723_v34, %v2723_v34  ;;  %v4712_v40 = vpack.c.bf16 %v2593_v35, %v2593_v35  ;;  %v5107_v41 = vpop.f32.mrb[60].mxu0 }
 0x15e   : > { %4001 = vst.msk [vmem:[%s5736_s27 + $0x2e0] sm:$0xf] %vm3816_vm1, %v4839_v36  ;;  %3876 = vst.msk [vmem:[%s5736_s27 + $0xec] sm:$0xf] %vm3816_vm1, %v4714_v37  ;;  %v4840_v42 = vpack.c.bf16 %v2721_v38, %v2721_v38  ;;  %v1762_v43 = vadd.f32 %v6050_v9, %v5107_v41  ;;  %v5235_v44 = vpop.f32.mrb[60].mxu1  ;;  %v1753_v45 = vpop.f32.mrb[61].mxu0 }
 0x15f   : > { %4004 = vst.msk [vmem:[%s5736_s27 + $0x2ec] sm:$0xf] %vm3816_vm1, %v4842_v39  ;;  %3874 = vst.msk [vmem:[%s5736_s27 + $0xe4] sm:$0xf] %vm3816_vm1, %v4712_v40  ;;  %v2274_v46 = vadd.f32 %v6050_v9, %v5235_v44  ;;  %v1754_v47 = vadd.f32 %v6050_v9, %v1753_v45  ;;  %v2265_v49 = vpop.f32.mrb[61].mxu1  ;;  %v5108_v50 = vpop.f32.mrb[62].mxu0 }
 0x160   : > { %4002 = vst.msk [vmem:[%s5736_s27 + $0x2e4] sm:$0xf] %vm3816_vm1, %v4840_v42  ;;  %v2598_v51 = vmax.f32 %v1762_v43, 0.0  ;;  %v2266_v52 = vadd.f32 %v6050_v9, %v2265_v49  ;;  %v1765_v53 = vadd.f32 %v6050_v9, %v5108_v50  ;;  %v5236_v54 = vpop.f32.mrb[62].mxu1  ;;  %v1756_v55 = vpop.f32.mrb[63].mxu0 }
 0x161   : > { %v2726_v56 = vmax.f32 %v2274_v46, 0.0  ;;  %v2596_v57 = vmax.f32 %v1754_v47, 0.0  ;;  %v2277_v58 = vadd.f32 %v6050_v9, %v5236_v54  ;;  %v1757_v59 = vadd.f32 %v6050_v9, %v1756_v55  ;;  %v2268_v60 = vpop.f32.mrb[63].mxu1 }
 0x162   : > { %v4717_v61 = vpack.c.bf16 %v2598_v51, %v2598_v51  ;;  %v2724_v62 = vmax.f32 %v2266_v52, 0.0  ;;  %v2599_v63 = vmax.f32 %v1765_v53, 0.0  ;;  %v2269_v0 = vadd.f32 %v6050_v9, %v2268_v60 }
 0x163   : > { %v4845_v1 = vpack.c.bf16 %v2726_v56, %v2726_v56  ;;  %v4715_v2 = vpack.c.bf16 %v2596_v57, %v2596_v57  ;;  %v2727_v3 = vmax.f32 %v2277_v58, 0.0  ;;  %v2597_v4 = vmax.f32 %v1757_v59, 0.0 }
 0x164   : > { %3879 = vst.msk [vmem:[%s5736_s27 + $0xf8] sm:$0xf] %vm3816_vm1, %v4717_v61  ;;  %v4843_v5 = vpack.c.bf16 %v2724_v62, %v2724_v62  ;;  %v4718_v6 = vpack.c.bf16 %v2599_v63, %v2599_v63  ;;  %v2725_v7 = vmax.f32 %v2269_v0, 0.0 }
 0x165   : > { %4007 = vst.msk [vmem:[%s5736_s27 + $0x2f8] sm:$0xf] %vm3816_vm1, %v4845_v1  ;;  %3877 = vst.msk [vmem:[%s5736_s27 + $0xf0] sm:$0xf] %vm3816_vm1, %v4715_v2  ;;  %v4846_v8 = vpack.c.bf16 %v2727_v3, %v2727_v3  ;;  %v4716_v48 = vpack.c.bf16 %v2597_v4, %v2597_v4  ;;  %v5111_v10 = vpop.f32.mrb[64].mxu0 }
 0x166   : > { %4005 = vst.msk [vmem:[%s5736_s27 + $0x2f0] sm:$0xf] %vm3816_vm1, %v4843_v5  ;;  %3880 = vst.msk [vmem:[%s5736_s27 + $0xfc] sm:$0xf] %vm3816_vm1, %v4718_v6  ;;  %v4844_v11 = vpack.c.bf16 %v2725_v7, %v2725_v7  ;;  %v1778_v12 = vadd.f32 %v6050_v9, %v5111_v10  ;;  %v5239_v13 = vpop.f32.mrb[64].mxu1  ;;  %v1769_v14 = vpop.f32.mrb[65].mxu0 }
 0x167   : > { %4008 = vst.msk [vmem:[%s5736_s27 + $0x2fc] sm:$0xf] %vm3816_vm1, %v4846_v8  ;;  %3878 = vst.msk [vmem:[%s5736_s27 + $0xf4] sm:$0xf] %vm3816_vm1, %v4716_v48  ;;  %v2290_v15 = vadd.f32 %v6050_v9, %v5239_v13  ;;  %v1770_v16 = vadd.f32 %v6050_v9, %v1769_v14  ;;  %v2281_v17 = vpop.f32.mrb[65].mxu1  ;;  %v5112_v18 = vpop.f32.mrb[66].mxu0 }
 0x168   : > { %4006 = vst.msk [vmem:[%s5736_s27 + $0x2f4] sm:$0xf] %vm3816_vm1, %v4844_v11  ;;  %v2602_v19 = vmax.f32 %v1778_v12, 0.0  ;;  %v2282_v20 = vadd.f32 %v6050_v9, %v2281_v17  ;;  %v1781_v21 = vadd.f32 %v6050_v9, %v5112_v18  ;;  %v5240_v22 = vpop.f32.mrb[66].mxu1  ;;  %v1772_v23 = vpop.f32.mrb[67].mxu0 }
 0x169   : > { %v2730_v24 = vmax.f32 %v2290_v15, 0.0  ;;  %v2600_v25 = vmax.f32 %v1770_v16, 0.0  ;;  %v2293_v26 = vadd.f32 %v6050_v9, %v5240_v22  ;;  %v1773_v27 = vadd.f32 %v6050_v9, %v1772_v23  ;;  %v2284_v28 = vpop.f32.mrb[67].mxu1 }
 0x16a   : > { %v4721_v29 = vpack.c.bf16 %v2602_v19, %v2602_v19  ;;  %v2728_v30 = vmax.f32 %v2282_v20, 0.0  ;;  %v2603_v31 = vmax.f32 %v1781_v21, 0.0  ;;  %v2285_v32 = vadd.f32 %v6050_v9, %v2284_v28 }
 0x16b   : > { %v4849_v33 = vpack.c.bf16 %v2730_v24, %v2730_v24  ;;  %v4719_v34 = vpack.c.bf16 %v2600_v25, %v2600_v25  ;;  %v2731_v35 = vmax.f32 %v2293_v26, 0.0  ;;  %v2601_v36 = vmax.f32 %v1773_v27, 0.0 }
 0x16c   : > { %3883 = vst.msk [vmem:[%s5736_s27 + $0x108] sm:$0xf] %vm3816_vm1, %v4721_v29  ;;  %v4847_v37 = vpack.c.bf16 %v2728_v30, %v2728_v30  ;;  %v4722_v38 = vpack.c.bf16 %v2603_v31, %v2603_v31  ;;  %v2729_v39 = vmax.f32 %v2285_v32, 0.0 }
 0x16d   : > { %4011 = vst.msk [vmem:[%s5736_s27 + $0x308] sm:$0xf] %vm3816_vm1, %v4849_v33  ;;  %3881 = vst.msk [vmem:[%s5736_s27 + $0x100] sm:$0xf] %vm3816_vm1, %v4719_v34  ;;  %v4850_v40 = vpack.c.bf16 %v2731_v35, %v2731_v35  ;;  %v4720_v41 = vpack.c.bf16 %v2601_v36, %v2601_v36  ;;  %v5115_v42 = vpop.f32.mrb[68].mxu0 }
 0x16e   : > { %4009 = vst.msk [vmem:[%s5736_s27 + $0x300] sm:$0xf] %vm3816_vm1, %v4847_v37  ;;  %3884 = vst.msk [vmem:[%s5736_s27 + $0x10c] sm:$0xf] %vm3816_vm1, %v4722_v38  ;;  %v4848_v43 = vpack.c.bf16 %v2729_v39, %v2729_v39  ;;  %v1794_v44 = vadd.f32 %v6050_v9, %v5115_v42  ;;  %v5243_v45 = vpop.f32.mrb[68].mxu1  ;;  %v1785_v46 = vpop.f32.mrb[69].mxu0 }
 0x16f   : > { %4012 = vst.msk [vmem:[%s5736_s27 + $0x30c] sm:$0xf] %vm3816_vm1, %v4850_v40  ;;  %3882 = vst.msk [vmem:[%s5736_s27 + $0x104] sm:$0xf] %vm3816_vm1, %v4720_v41  ;;  %v2306_v47 = vadd.f32 %v6050_v9, %v5243_v45  ;;  %v1786_v49 = vadd.f32 %v6050_v9, %v1785_v46  ;;  %v2297_v50 = vpop.f32.mrb[69].mxu1  ;;  %v5116_v51 = vpop.f32.mrb[70].mxu0 }
 0x170   : > { %4010 = vst.msk [vmem:[%s5736_s27 + $0x304] sm:$0xf] %vm3816_vm1, %v4848_v43  ;;  %v2606_v52 = vmax.f32 %v1794_v44, 0.0  ;;  %v2298_v53 = vadd.f32 %v6050_v9, %v2297_v50  ;;  %v1797_v54 = vadd.f32 %v6050_v9, %v5116_v51  ;;  %v5244_v55 = vpop.f32.mrb[70].mxu1  ;;  %v1788_v56 = vpop.f32.mrb[71].mxu0 }
 0x171   : > { %v2734_v57 = vmax.f32 %v2306_v47, 0.0  ;;  %v2604_v58 = vmax.f32 %v1786_v49, 0.0  ;;  %v2309_v59 = vadd.f32 %v6050_v9, %v5244_v55  ;;  %v1789_v60 = vadd.f32 %v6050_v9, %v1788_v56  ;;  %v2300_v61 = vpop.f32.mrb[71].mxu1 }
 0x172   : > { %v4725_v62 = vpack.c.bf16 %v2606_v52, %v2606_v52  ;;  %v2732_v63 = vmax.f32 %v2298_v53, 0.0  ;;  %v2607_v0 = vmax.f32 %v1797_v54, 0.0  ;;  %v2301_v1 = vadd.f32 %v6050_v9, %v2300_v61 }
 0x173   : > { %v4853_v2 = vpack.c.bf16 %v2734_v57, %v2734_v57  ;;  %v4723_v3 = vpack.c.bf16 %v2604_v58, %v2604_v58  ;;  %v2735_v4 = vmax.f32 %v2309_v59, 0.0  ;;  %v2605_v5 = vmax.f32 %v1789_v60, 0.0 }
 0x174   : > { %3887 = vst.msk [vmem:[%s5736_s27 + $0x118] sm:$0xf] %vm3816_vm1, %v4725_v62  ;;  %v4851_v6 = vpack.c.bf16 %v2732_v63, %v2732_v63  ;;  %v4726_v7 = vpack.c.bf16 %v2607_v0, %v2607_v0  ;;  %v2733_v8 = vmax.f32 %v2301_v1, 0.0 }
 0x175   : > { %4015 = vst.msk [vmem:[%s5736_s27 + $0x318] sm:$0xf] %vm3816_vm1, %v4853_v2  ;;  %3885 = vst.msk [vmem:[%s5736_s27 + $0x110] sm:$0xf] %vm3816_vm1, %v4723_v3  ;;  %v4854_v48 = vpack.c.bf16 %v2735_v4, %v2735_v4  ;;  %v4724_v10 = vpack.c.bf16 %v2605_v5, %v2605_v5  ;;  %v5119_v11 = vpop.f32.mrb[72].mxu0 }
 0x176   : > { %4013 = vst.msk [vmem:[%s5736_s27 + $0x310] sm:$0xf] %vm3816_vm1, %v4851_v6  ;;  %3888 = vst.msk [vmem:[%s5736_s27 + $0x11c] sm:$0xf] %vm3816_vm1, %v4726_v7  ;;  %v4852_v12 = vpack.c.bf16 %v2733_v8, %v2733_v8  ;;  %v1810_v13 = vadd.f32 %v6050_v9, %v5119_v11  ;;  %v5247_v14 = vpop.f32.mrb[72].mxu1  ;;  %v1801_v15 = vpop.f32.mrb[73].mxu0 }
 0x177   : > { %4016 = vst.msk [vmem:[%s5736_s27 + $0x31c] sm:$0xf] %vm3816_vm1, %v4854_v48  ;;  %3886 = vst.msk [vmem:[%s5736_s27 + $0x114] sm:$0xf] %vm3816_vm1, %v4724_v10  ;;  %v2322_v16 = vadd.f32 %v6050_v9, %v5247_v14  ;;  %v1802_v17 = vadd.f32 %v6050_v9, %v1801_v15  ;;  %v2313_v18 = vpop.f32.mrb[73].mxu1  ;;  %v5120_v19 = vpop.f32.mrb[74].mxu0 }
 0x178   : > { %4014 = vst.msk [vmem:[%s5736_s27 + $0x314] sm:$0xf] %vm3816_vm1, %v4852_v12  ;;  %v2610_v20 = vmax.f32 %v1810_v13, 0.0  ;;  %v2314_v21 = vadd.f32 %v6050_v9, %v2313_v18  ;;  %v1813_v22 = vadd.f32 %v6050_v9, %v5120_v19  ;;  %v5248_v23 = vpop.f32.mrb[74].mxu1  ;;  %v1804_v24 = vpop.f32.mrb[75].mxu0 }
 0x179   : > { %v2738_v25 = vmax.f32 %v2322_v16, 0.0  ;;  %v2608_v26 = vmax.f32 %v1802_v17, 0.0  ;;  %v2325_v27 = vadd.f32 %v6050_v9, %v5248_v23  ;;  %v1805_v28 = vadd.f32 %v6050_v9, %v1804_v24  ;;  %v2316_v29 = vpop.f32.mrb[75].mxu1 }
 0x17a   : > { %v4729_v30 = vpack.c.bf16 %v2610_v20, %v2610_v20  ;;  %v2736_v31 = vmax.f32 %v2314_v21, 0.0  ;;  %v2611_v32 = vmax.f32 %v1813_v22, 0.0  ;;  %v2317_v33 = vadd.f32 %v6050_v9, %v2316_v29 }
 0x17b   : > { %v4857_v34 = vpack.c.bf16 %v2738_v25, %v2738_v25  ;;  %v4727_v35 = vpack.c.bf16 %v2608_v26, %v2608_v26  ;;  %v2739_v36 = vmax.f32 %v2325_v27, 0.0  ;;  %v2609_v37 = vmax.f32 %v1805_v28, 0.0 }
 0x17c   : > { %3891 = vst.msk [vmem:[%s5736_s27 + $0x128] sm:$0xf] %vm3816_vm1, %v4729_v30  ;;  %v4855_v38 = vpack.c.bf16 %v2736_v31, %v2736_v31  ;;  %v4730_v39 = vpack.c.bf16 %v2611_v32, %v2611_v32  ;;  %v2737_v40 = vmax.f32 %v2317_v33, 0.0 }
 0x17d   : > { %4019 = vst.msk [vmem:[%s5736_s27 + $0x328] sm:$0xf] %vm3816_vm1, %v4857_v34  ;;  %3889 = vst.msk [vmem:[%s5736_s27 + $0x120] sm:$0xf] %vm3816_vm1, %v4727_v35  ;;  %v4858_v41 = vpack.c.bf16 %v2739_v36, %v2739_v36  ;;  %v4728_v42 = vpack.c.bf16 %v2609_v37, %v2609_v37  ;;  %v5123_v43 = vpop.f32.mrb[76].mxu0 }
 0x17e   : > { %4017 = vst.msk [vmem:[%s5736_s27 + $0x320] sm:$0xf] %vm3816_vm1, %v4855_v38  ;;  %3892 = vst.msk [vmem:[%s5736_s27 + $0x12c] sm:$0xf] %vm3816_vm1, %v4730_v39  ;;  %v4856_v44 = vpack.c.bf16 %v2737_v40, %v2737_v40  ;;  %v1826_v45 = vadd.f32 %v6050_v9, %v5123_v43  ;;  %v5251_v46 = vpop.f32.mrb[76].mxu1  ;;  %v1817_v47 = vpop.f32.mrb[77].mxu0 }
 0x17f   : > { %4020 = vst.msk [vmem:[%s5736_s27 + $0x32c] sm:$0xf] %vm3816_vm1, %v4858_v41  ;;  %3890 = vst.msk [vmem:[%s5736_s27 + $0x124] sm:$0xf] %vm3816_vm1, %v4728_v42  ;;  %v2338_v49 = vadd.f32 %v6050_v9, %v5251_v46  ;;  %v1818_v50 = vadd.f32 %v6050_v9, %v1817_v47  ;;  %v2329_v51 = vpop.f32.mrb[77].mxu1  ;;  %v5124_v52 = vpop.f32.mrb[78].mxu0 }
 0x180   : > { %4018 = vst.msk [vmem:[%s5736_s27 + $0x324] sm:$0xf] %vm3816_vm1, %v4856_v44  ;;  %v2614_v53 = vmax.f32 %v1826_v45, 0.0  ;;  %v2330_v54 = vadd.f32 %v6050_v9, %v2329_v51  ;;  %v1829_v55 = vadd.f32 %v6050_v9, %v5124_v52  ;;  %v5252_v56 = vpop.f32.mrb[78].mxu1  ;;  %v1820_v57 = vpop.f32.mrb[79].mxu0 }
 0x181   : > { %v2742_v58 = vmax.f32 %v2338_v49, 0.0  ;;  %v2612_v59 = vmax.f32 %v1818_v50, 0.0  ;;  %v2341_v60 = vadd.f32 %v6050_v9, %v5252_v56  ;;  %v1821_v61 = vadd.f32 %v6050_v9, %v1820_v57  ;;  %v2332_v62 = vpop.f32.mrb[79].mxu1 }
 0x182   : > { %v4733_v63 = vpack.c.bf16 %v2614_v53, %v2614_v53  ;;  %v2740_v0 = vmax.f32 %v2330_v54, 0.0  ;;  %v2615_v1 = vmax.f32 %v1829_v55, 0.0  ;;  %v2333_v2 = vadd.f32 %v6050_v9, %v2332_v62 }
 0x183   : > { %v4861_v3 = vpack.c.bf16 %v2742_v58, %v2742_v58  ;;  %v4731_v4 = vpack.c.bf16 %v2612_v59, %v2612_v59  ;;  %v2743_v5 = vmax.f32 %v2341_v60, 0.0  ;;  %v2613_v6 = vmax.f32 %v1821_v61, 0.0 }
 0x184   : > { %3895 = vst.msk [vmem:[%s5736_s27 + $0x138] sm:$0xf] %vm3816_vm1, %v4733_v63  ;;  %v4859_v7 = vpack.c.bf16 %v2740_v0, %v2740_v0  ;;  %v4734_v8 = vpack.c.bf16 %v2615_v1, %v2615_v1  ;;  %v2741_v48 = vmax.f32 %v2333_v2, 0.0 }
 0x185   : > { %4023 = vst.msk [vmem:[%s5736_s27 + $0x338] sm:$0xf] %vm3816_vm1, %v4861_v3  ;;  %3893 = vst.msk [vmem:[%s5736_s27 + $0x130] sm:$0xf] %vm3816_vm1, %v4731_v4  ;;  %v4862_v10 = vpack.c.bf16 %v2743_v5, %v2743_v5  ;;  %v4732_v11 = vpack.c.bf16 %v2613_v6, %v2613_v6  ;;  %v5127_v12 = vpop.f32.mrb[80].mxu0 }
 0x186   : > { %4021 = vst.msk [vmem:[%s5736_s27 + $0x330] sm:$0xf] %vm3816_vm1, %v4859_v7  ;;  %3896 = vst.msk [vmem:[%s5736_s27 + $0x13c] sm:$0xf] %vm3816_vm1, %v4734_v8  ;;  %v4860_v13 = vpack.c.bf16 %v2741_v48, %v2741_v48  ;;  %v1842_v14 = vadd.f32 %v6050_v9, %v5127_v12  ;;  %v5255_v15 = vpop.f32.mrb[80].mxu1  ;;  %v1833_v16 = vpop.f32.mrb[81].mxu0 }
 0x187   : > { %4024 = vst.msk [vmem:[%s5736_s27 + $0x33c] sm:$0xf] %vm3816_vm1, %v4862_v10  ;;  %3894 = vst.msk [vmem:[%s5736_s27 + $0x134] sm:$0xf] %vm3816_vm1, %v4732_v11  ;;  %v2354_v17 = vadd.f32 %v6050_v9, %v5255_v15  ;;  %v1834_v18 = vadd.f32 %v6050_v9, %v1833_v16  ;;  %v2345_v19 = vpop.f32.mrb[81].mxu1  ;;  %v5128_v20 = vpop.f32.mrb[82].mxu0 }
 0x188   : > { %4022 = vst.msk [vmem:[%s5736_s27 + $0x334] sm:$0xf] %vm3816_vm1, %v4860_v13  ;;  %v2618_v21 = vmax.f32 %v1842_v14, 0.0  ;;  %v2346_v22 = vadd.f32 %v6050_v9, %v2345_v19  ;;  %v1845_v23 = vadd.f32 %v6050_v9, %v5128_v20  ;;  %v5256_v24 = vpop.f32.mrb[82].mxu1  ;;  %v1836_v25 = vpop.f32.mrb[83].mxu0 }
 0x189   : > { %v2746_v26 = vmax.f32 %v2354_v17, 0.0  ;;  %v2616_v27 = vmax.f32 %v1834_v18, 0.0  ;;  %v2357_v28 = vadd.f32 %v6050_v9, %v5256_v24  ;;  %v1837_v29 = vadd.f32 %v6050_v9, %v1836_v25  ;;  %v2348_v30 = vpop.f32.mrb[83].mxu1 }
 0x18a   : > { %v4737_v31 = vpack.c.bf16 %v2618_v21, %v2618_v21  ;;  %v2744_v32 = vmax.f32 %v2346_v22, 0.0  ;;  %v2619_v33 = vmax.f32 %v1845_v23, 0.0  ;;  %v2349_v34 = vadd.f32 %v6050_v9, %v2348_v30 }
 0x18b   : > { %v4865_v35 = vpack.c.bf16 %v2746_v26, %v2746_v26  ;;  %v4735_v36 = vpack.c.bf16 %v2616_v27, %v2616_v27  ;;  %v2747_v37 = vmax.f32 %v2357_v28, 0.0  ;;  %v2617_v38 = vmax.f32 %v1837_v29, 0.0 }
 0x18c   : > { %3899 = vst.msk [vmem:[%s5736_s27 + $0x148] sm:$0xf] %vm3816_vm1, %v4737_v31  ;;  %v4863_v39 = vpack.c.bf16 %v2744_v32, %v2744_v32  ;;  %v4738_v40 = vpack.c.bf16 %v2619_v33, %v2619_v33  ;;  %v2745_v41 = vmax.f32 %v2349_v34, 0.0 }
 0x18d   : > { %4027 = vst.msk [vmem:[%s5736_s27 + $0x348] sm:$0xf] %vm3816_vm1, %v4865_v35  ;;  %3897 = vst.msk [vmem:[%s5736_s27 + $0x140] sm:$0xf] %vm3816_vm1, %v4735_v36  ;;  %v4866_v42 = vpack.c.bf16 %v2747_v37, %v2747_v37  ;;  %v4736_v43 = vpack.c.bf16 %v2617_v38, %v2617_v38  ;;  %v5131_v44 = vpop.f32.mrb[84].mxu0 }
 0x18e   : > { %4025 = vst.msk [vmem:[%s5736_s27 + $0x340] sm:$0xf] %vm3816_vm1, %v4863_v39  ;;  %3900 = vst.msk [vmem:[%s5736_s27 + $0x14c] sm:$0xf] %vm3816_vm1, %v4738_v40  ;;  %v4864_v45 = vpack.c.bf16 %v2745_v41, %v2745_v41  ;;  %v1858_v46 = vadd.f32 %v6050_v9, %v5131_v44  ;;  %v5259_v47 = vpop.f32.mrb[84].mxu1  ;;  %v1849_v49 = vpop.f32.mrb[85].mxu0 }
 0x18f   : > { %4028 = vst.msk [vmem:[%s5736_s27 + $0x34c] sm:$0xf] %vm3816_vm1, %v4866_v42  ;;  %3898 = vst.msk [vmem:[%s5736_s27 + $0x144] sm:$0xf] %vm3816_vm1, %v4736_v43  ;;  %v2370_v50 = vadd.f32 %v6050_v9, %v5259_v47  ;;  %v1850_v51 = vadd.f32 %v6050_v9, %v1849_v49  ;;  %v2361_v52 = vpop.f32.mrb[85].mxu1  ;;  %v5132_v53 = vpop.f32.mrb[86].mxu0 }
 0x190   : > { %4026 = vst.msk [vmem:[%s5736_s27 + $0x344] sm:$0xf] %vm3816_vm1, %v4864_v45  ;;  %v2622_v54 = vmax.f32 %v1858_v46, 0.0  ;;  %v2362_v55 = vadd.f32 %v6050_v9, %v2361_v52  ;;  %v1861_v56 = vadd.f32 %v6050_v9, %v5132_v53  ;;  %v5260_v57 = vpop.f32.mrb[86].mxu1  ;;  %v1852_v58 = vpop.f32.mrb[87].mxu0 }
 0x191   : > { %v2750_v59 = vmax.f32 %v2370_v50, 0.0  ;;  %v2620_v60 = vmax.f32 %v1850_v51, 0.0  ;;  %v2373_v61 = vadd.f32 %v6050_v9, %v5260_v57  ;;  %v1853_v62 = vadd.f32 %v6050_v9, %v1852_v58  ;;  %v2364_v63 = vpop.f32.mrb[87].mxu1 }
 0x192   : > { %v4741_v0 = vpack.c.bf16 %v2622_v54, %v2622_v54  ;;  %v2748_v1 = vmax.f32 %v2362_v55, 0.0  ;;  %v2623_v2 = vmax.f32 %v1861_v56, 0.0  ;;  %v2365_v3 = vadd.f32 %v6050_v9, %v2364_v63 }
 0x193   : > { %v4869_v4 = vpack.c.bf16 %v2750_v59, %v2750_v59  ;;  %v4739_v5 = vpack.c.bf16 %v2620_v60, %v2620_v60  ;;  %v2751_v6 = vmax.f32 %v2373_v61, 0.0  ;;  %v2621_v7 = vmax.f32 %v1853_v62, 0.0 }
 0x194   : > { %3903 = vst.msk [vmem:[%s5736_s27 + $0x158] sm:$0xf] %vm3816_vm1, %v4741_v0  ;;  %v4867_v8 = vpack.c.bf16 %v2748_v1, %v2748_v1  ;;  %v4742_v48 = vpack.c.bf16 %v2623_v2, %v2623_v2  ;;  %v2749_v10 = vmax.f32 %v2365_v3, 0.0 }
 0x195   : > { %4031 = vst.msk [vmem:[%s5736_s27 + $0x358] sm:$0xf] %vm3816_vm1, %v4869_v4  ;;  %3901 = vst.msk [vmem:[%s5736_s27 + $0x150] sm:$0xf] %vm3816_vm1, %v4739_v5  ;;  %v4870_v11 = vpack.c.bf16 %v2751_v6, %v2751_v6  ;;  %v4740_v12 = vpack.c.bf16 %v2621_v7, %v2621_v7  ;;  %v5135_v13 = vpop.f32.mrb[88].mxu0 }
 0x196   : > { %4029 = vst.msk [vmem:[%s5736_s27 + $0x350] sm:$0xf] %vm3816_vm1, %v4867_v8  ;;  %3904 = vst.msk [vmem:[%s5736_s27 + $0x15c] sm:$0xf] %vm3816_vm1, %v4742_v48  ;;  %v4868_v14 = vpack.c.bf16 %v2749_v10, %v2749_v10  ;;  %v1874_v15 = vadd.f32 %v6050_v9, %v5135_v13  ;;  %v5263_v16 = vpop.f32.mrb[88].mxu1  ;;  %v1865_v17 = vpop.f32.mrb[89].mxu0 }
 0x197   : > { %4032 = vst.msk [vmem:[%s5736_s27 + $0x35c] sm:$0xf] %vm3816_vm1, %v4870_v11  ;;  %3902 = vst.msk [vmem:[%s5736_s27 + $0x154] sm:$0xf] %vm3816_vm1, %v4740_v12  ;;  %v2386_v18 = vadd.f32 %v6050_v9, %v5263_v16  ;;  %v1866_v19 = vadd.f32 %v6050_v9, %v1865_v17  ;;  %v2377_v20 = vpop.f32.mrb[89].mxu1  ;;  %v5136_v21 = vpop.f32.mrb[90].mxu0 }
 0x198   : > { %4030 = vst.msk [vmem:[%s5736_s27 + $0x354] sm:$0xf] %vm3816_vm1, %v4868_v14  ;;  %v2626_v22 = vmax.f32 %v1874_v15, 0.0  ;;  %v2378_v23 = vadd.f32 %v6050_v9, %v2377_v20  ;;  %v1877_v24 = vadd.f32 %v6050_v9, %v5136_v21  ;;  %v5264_v25 = vpop.f32.mrb[90].mxu1  ;;  %v1868_v26 = vpop.f32.mrb[91].mxu0 }
 0x199   : > { %v2754_v27 = vmax.f32 %v2386_v18, 0.0  ;;  %v2624_v28 = vmax.f32 %v1866_v19, 0.0  ;;  %v2389_v29 = vadd.f32 %v6050_v9, %v5264_v25  ;;  %v1869_v30 = vadd.f32 %v6050_v9, %v1868_v26  ;;  %v2380_v31 = vpop.f32.mrb[91].mxu1 }
 0x19a   : > { %v4745_v32 = vpack.c.bf16 %v2626_v22, %v2626_v22  ;;  %v2752_v33 = vmax.f32 %v2378_v23, 0.0  ;;  %v2627_v34 = vmax.f32 %v1877_v24, 0.0  ;;  %v2381_v35 = vadd.f32 %v6050_v9, %v2380_v31 }
 0x19b   : > { %v4873_v36 = vpack.c.bf16 %v2754_v27, %v2754_v27  ;;  %v4743_v37 = vpack.c.bf16 %v2624_v28, %v2624_v28  ;;  %v2755_v38 = vmax.f32 %v2389_v29, 0.0  ;;  %v2625_v39 = vmax.f32 %v1869_v30, 0.0 }
 0x19c   : > { %3907 = vst.msk [vmem:[%s5736_s27 + $0x168] sm:$0xf] %vm3816_vm1, %v4745_v32  ;;  %v4871_v40 = vpack.c.bf16 %v2752_v33, %v2752_v33  ;;  %v4746_v41 = vpack.c.bf16 %v2627_v34, %v2627_v34  ;;  %v2753_v42 = vmax.f32 %v2381_v35, 0.0 }
 0x19d   : > { %4035 = vst.msk [vmem:[%s5736_s27 + $0x368] sm:$0xf] %vm3816_vm1, %v4873_v36  ;;  %3905 = vst.msk [vmem:[%s5736_s27 + $0x160] sm:$0xf] %vm3816_vm1, %v4743_v37  ;;  %v4874_v43 = vpack.c.bf16 %v2755_v38, %v2755_v38  ;;  %v4744_v44 = vpack.c.bf16 %v2625_v39, %v2625_v39  ;;  %v5139_v45 = vpop.f32.mrb[92].mxu0 }
 0x19e   : > { %4033 = vst.msk [vmem:[%s5736_s27 + $0x360] sm:$0xf] %vm3816_vm1, %v4871_v40  ;;  %3908 = vst.msk [vmem:[%s5736_s27 + $0x16c] sm:$0xf] %vm3816_vm1, %v4746_v41  ;;  %v4872_v46 = vpack.c.bf16 %v2753_v42, %v2753_v42  ;;  %v1890_v47 = vadd.f32 %v6050_v9, %v5139_v45  ;;  %v5267_v49 = vpop.f32.mrb[92].mxu1  ;;  %v1881_v50 = vpop.f32.mrb[93].mxu0 }
 0x19f   : > { %4036 = vst.msk [vmem:[%s5736_s27 + $0x36c] sm:$0xf] %vm3816_vm1, %v4874_v43  ;;  %3906 = vst.msk [vmem:[%s5736_s27 + $0x164] sm:$0xf] %vm3816_vm1, %v4744_v44  ;;  %v2402_v51 = vadd.f32 %v6050_v9, %v5267_v49  ;;  %v1882_v52 = vadd.f32 %v6050_v9, %v1881_v50  ;;  %v2393_v53 = vpop.f32.mrb[93].mxu1  ;;  %v5140_v54 = vpop.f32.mrb[94].mxu0 }
 0x1a0   : > { %4034 = vst.msk [vmem:[%s5736_s27 + $0x364] sm:$0xf] %vm3816_vm1, %v4872_v46  ;;  %v2630_v55 = vmax.f32 %v1890_v47, 0.0  ;;  %v2394_v56 = vadd.f32 %v6050_v9, %v2393_v53  ;;  %v1893_v57 = vadd.f32 %v6050_v9, %v5140_v54  ;;  %v5268_v58 = vpop.f32.mrb[94].mxu1  ;;  %v1884_v59 = vpop.f32.mrb[95].mxu0 }
 0x1a1   : > { %v2758_v60 = vmax.f32 %v2402_v51, 0.0  ;;  %v2628_v61 = vmax.f32 %v1882_v52, 0.0  ;;  %v2405_v62 = vadd.f32 %v6050_v9, %v5268_v58  ;;  %v1885_v63 = vadd.f32 %v6050_v9, %v1884_v59  ;;  %v2396_v0 = vpop.f32.mrb[95].mxu1  ;;  %v6367_v47 = vld [vmem:[%s6548_s2] ss:$0 sm:$0xff] }
 0x1a2   : > { %v4749_v1 = vpack.c.bf16 %v2630_v55, %v2630_v55  ;;  %v2756_v2 = vmax.f32 %v2394_v56, 0.0  ;;  %v2631_v3 = vmax.f32 %v1893_v57, 0.0  ;;  %v2397_v4 = vadd.f32 %v6050_v9, %v2396_v0 }
 0x1a3   : > { %v4877_v5 = vpack.c.bf16 %v2758_v60, %v2758_v60  ;;  %v4747_v6 = vpack.c.bf16 %v2628_v61, %v2628_v61  ;;  %v2759_v7 = vmax.f32 %v2405_v62, 0.0  ;;  %v2629_v8 = vmax.f32 %v1885_v63, 0.0 }
 0x1a4   : > { %3911 = vst.msk [vmem:[%s5736_s27 + $0x178] sm:$0xf] %vm3816_vm1, %v4749_v1  ;;  %v4875_v48 = vpack.c.bf16 %v2756_v2, %v2756_v2  ;;  %v4750_v10 = vpack.c.bf16 %v2631_v3, %v2631_v3  ;;  %v2757_v11 = vmax.f32 %v2397_v4, 0.0 }
 0x1a5   : > { %4039 = vst.msk [vmem:[%s5736_s27 + $0x378] sm:$0xf] %vm3816_vm1, %v4877_v5  ;;  %3909 = vst.msk [vmem:[%s5736_s27 + $0x170] sm:$0xf] %vm3816_vm1, %v4747_v6  ;;  %v4878_v12 = vpack.c.bf16 %v2759_v7, %v2759_v7  ;;  %v4748_v13 = vpack.c.bf16 %v2629_v8, %v2629_v8  ;;  %v5143_v14 = vpop.f32.mrb[96].mxu0 }
 0x1a6   : > { %4037 = vst.msk [vmem:[%s5736_s27 + $0x370] sm:$0xf] %vm3816_vm1, %v4875_v48  ;;  %3912 = vst.msk [vmem:[%s5736_s27 + $0x17c] sm:$0xf] %vm3816_vm1, %v4750_v10  ;;  %v4876_v15 = vpack.c.bf16 %v2757_v11, %v2757_v11  ;;  %v1906_v16 = vadd.f32 %v6050_v9, %v5143_v14  ;;  %v5271_v17 = vpop.f32.mrb[96].mxu1  ;;  %v1897_v18 = vpop.f32.mrb[97].mxu0 }
 0x1a7   : > { %4040 = vst.msk [vmem:[%s5736_s27 + $0x37c] sm:$0xf] %vm3816_vm1, %v4878_v12  ;;  %3910 = vst.msk [vmem:[%s5736_s27 + $0x174] sm:$0xf] %vm3816_vm1, %v4748_v13  ;;  %v2418_v19 = vadd.f32 %v6050_v9, %v5271_v17  ;;  %v1898_v20 = vadd.f32 %v6050_v9, %v1897_v18  ;;  %v2409_v21 = vpop.f32.mrb[97].mxu1  ;;  %v5144_v22 = vpop.f32.mrb[98].mxu0 }
 0x1a8   : > { %4038 = vst.msk [vmem:[%s5736_s27 + $0x374] sm:$0xf] %vm3816_vm1, %v4876_v15  ;;  %v2634_v23 = vmax.f32 %v1906_v16, 0.0  ;;  %v2410_v24 = vadd.f32 %v6050_v9, %v2409_v21  ;;  %v1909_v25 = vadd.f32 %v6050_v9, %v5144_v22  ;;  %v5272_v26 = vpop.f32.mrb[98].mxu1  ;;  %v1900_v27 = vpop.f32.mrb[99].mxu0 }
 0x1a9   : > { %v2762_v28 = vmax.f32 %v2418_v19, 0.0  ;;  %v2632_v29 = vmax.f32 %v1898_v20, 0.0  ;;  %v2421_v30 = vadd.f32 %v6050_v9, %v5272_v26  ;;  %v1901_v31 = vadd.f32 %v6050_v9, %v1900_v27  ;;  %v2412_v32 = vpop.f32.mrb[99].mxu1 }
 0x1aa   : > { %v4753_v33 = vpack.c.bf16 %v2634_v23, %v2634_v23  ;;  %v2760_v34 = vmax.f32 %v2410_v24, 0.0  ;;  %v2635_v35 = vmax.f32 %v1909_v25, 0.0  ;;  %v2413_v36 = vadd.f32 %v6050_v9, %v2412_v32 }
 0x1ab   : > { %v4881_v37 = vpack.c.bf16 %v2762_v28, %v2762_v28  ;;  %v4751_v38 = vpack.c.bf16 %v2632_v29, %v2632_v29  ;;  %v2763_v39 = vmax.f32 %v2421_v30, 0.0  ;;  %v2633_v40 = vmax.f32 %v1901_v31, 0.0 }
 0x1ac   : > { %3915 = vst.msk [vmem:[%s5736_s27 + $0x188] sm:$0xf] %vm3816_vm1, %v4753_v33  ;;  %v4879_v41 = vpack.c.bf16 %v2760_v34, %v2760_v34  ;;  %v4754_v42 = vpack.c.bf16 %v2635_v35, %v2635_v35  ;;  %v2761_v43 = vmax.f32 %v2413_v36, 0.0 }
 0x1ad   : > { %4043 = vst.msk [vmem:[%s5736_s27 + $0x388] sm:$0xf] %vm3816_vm1, %v4881_v37  ;;  %3913 = vst.msk [vmem:[%s5736_s27 + $0x180] sm:$0xf] %vm3816_vm1, %v4751_v38  ;;  %v4882_v44 = vpack.c.bf16 %v2763_v39, %v2763_v39  ;;  %v4752_v45 = vpack.c.bf16 %v2633_v40, %v2633_v40  ;;  %v5147_v46 = vpop.f32.mrb[100].mxu0 }
 0x1ae   : > { %4041 = vst.msk [vmem:[%s5736_s27 + $0x380] sm:$0xf] %vm3816_vm1, %v4879_v41  ;;  %3916 = vst.msk [vmem:[%s5736_s27 + $0x18c] sm:$0xf] %vm3816_vm1, %v4754_v42  ;;  %v4880_v9 = vpack.c.bf16 %v2761_v43, %v2761_v43  ;;  %v1922_v49 = vadd.f32 %v6367_v47, %v5147_v46  ;;  %v5275_v50 = vpop.f32.mrb[100].mxu1  ;;  %v1913_v51 = vpop.f32.mrb[101].mxu0 }
 0x1af   : > { %4044 = vst.msk [vmem:[%s5736_s27 + $0x38c] sm:$0xf] %vm3816_vm1, %v4882_v44  ;;  %3914 = vst.msk [vmem:[%s5736_s27 + $0x184] sm:$0xf] %vm3816_vm1, %v4752_v45  ;;  %v2434_v52 = vadd.f32 %v6367_v47, %v5275_v50  ;;  %v1914_v53 = vadd.f32 %v6367_v47, %v1913_v51  ;;  %v2425_v54 = vpop.f32.mrb[101].mxu1  ;;  %v5148_v55 = vpop.f32.mrb[102].mxu0 }
 0x1b0   : > { %4042 = vst.msk [vmem:[%s5736_s27 + $0x384] sm:$0xf] %vm3816_vm1, %v4880_v9  ;;  %v2638_v56 = vmax.f32 %v1922_v49, 0.0  ;;  %v2426_v57 = vadd.f32 %v6367_v47, %v2425_v54  ;;  %v1925_v58 = vadd.f32 %v6367_v47, %v5148_v55  ;;  %v5276_v59 = vpop.f32.mrb[102].mxu1  ;;  %v1916_v60 = vpop.f32.mrb[103].mxu0 }
 0x1b1   : > { %v2766_v61 = vmax.f32 %v2434_v52, 0.0  ;;  %v2636_v62 = vmax.f32 %v1914_v53, 0.0  ;;  %v2437_v63 = vadd.f32 %v6367_v47, %v5276_v59  ;;  %v1917_v0 = vadd.f32 %v6367_v47, %v1916_v60  ;;  %v2428_v1 = vpop.f32.mrb[103].mxu1 }
 0x1b2   : > { %v4757_v2 = vpack.c.bf16 %v2638_v56, %v2638_v56  ;;  %v2764_v3 = vmax.f32 %v2426_v57, 0.0  ;;  %v2639_v4 = vmax.f32 %v1925_v58, 0.0  ;;  %v2429_v5 = vadd.f32 %v6367_v47, %v2428_v1 }
 0x1b3   : > { %v4885_v6 = vpack.c.bf16 %v2766_v61, %v2766_v61  ;;  %v4755_v7 = vpack.c.bf16 %v2636_v62, %v2636_v62  ;;  %v2767_v8 = vmax.f32 %v2437_v63, 0.0  ;;  %v2637_v48 = vmax.f32 %v1917_v0, 0.0 }
 0x1b4   : > { %3919 = vst.msk [vmem:[%s5736_s27 + $0x198] sm:$0xf] %vm3816_vm1, %v4757_v2  ;;  %v4883_v10 = vpack.c.bf16 %v2764_v3, %v2764_v3  ;;  %v4758_v11 = vpack.c.bf16 %v2639_v4, %v2639_v4  ;;  %v2765_v12 = vmax.f32 %v2429_v5, 0.0 }
 0x1b5   : > { %4047 = vst.msk [vmem:[%s5736_s27 + $0x398] sm:$0xf] %vm3816_vm1, %v4885_v6  ;;  %3917 = vst.msk [vmem:[%s5736_s27 + $0x190] sm:$0xf] %vm3816_vm1, %v4755_v7  ;;  %v4886_v13 = vpack.c.bf16 %v2767_v8, %v2767_v8  ;;  %v4756_v14 = vpack.c.bf16 %v2637_v48, %v2637_v48  ;;  %v5151_v15 = vpop.f32.mrb[104].mxu0 }
 0x1b6   : > { %4045 = vst.msk [vmem:[%s5736_s27 + $0x390] sm:$0xf] %vm3816_vm1, %v4883_v10  ;;  %3920 = vst.msk [vmem:[%s5736_s27 + $0x19c] sm:$0xf] %vm3816_vm1, %v4758_v11  ;;  %v4884_v16 = vpack.c.bf16 %v2765_v12, %v2765_v12  ;;  %v1938_v17 = vadd.f32 %v6367_v47, %v5151_v15  ;;  %v5279_v18 = vpop.f32.mrb[104].mxu1  ;;  %v1929_v19 = vpop.f32.mrb[105].mxu0 }
 0x1b7   : > { %4048 = vst.msk [vmem:[%s5736_s27 + $0x39c] sm:$0xf] %vm3816_vm1, %v4886_v13  ;;  %3918 = vst.msk [vmem:[%s5736_s27 + $0x194] sm:$0xf] %vm3816_vm1, %v4756_v14  ;;  %v2450_v20 = vadd.f32 %v6367_v47, %v5279_v18  ;;  %v1930_v21 = vadd.f32 %v6367_v47, %v1929_v19  ;;  %v2441_v22 = vpop.f32.mrb[105].mxu1  ;;  %v5152_v23 = vpop.f32.mrb[106].mxu0 }
 0x1b8   : > { %4046 = vst.msk [vmem:[%s5736_s27 + $0x394] sm:$0xf] %vm3816_vm1, %v4884_v16  ;;  %v2642_v24 = vmax.f32 %v1938_v17, 0.0  ;;  %v2442_v25 = vadd.f32 %v6367_v47, %v2441_v22  ;;  %v1941_v26 = vadd.f32 %v6367_v47, %v5152_v23  ;;  %v5280_v27 = vpop.f32.mrb[106].mxu1  ;;  %v1932_v28 = vpop.f32.mrb[107].mxu0 }
 0x1b9   : > { %v2770_v29 = vmax.f32 %v2450_v20, 0.0  ;;  %v2640_v30 = vmax.f32 %v1930_v21, 0.0  ;;  %v2453_v31 = vadd.f32 %v6367_v47, %v5280_v27  ;;  %v1933_v32 = vadd.f32 %v6367_v47, %v1932_v28  ;;  %v2444_v33 = vpop.f32.mrb[107].mxu1 }
 0x1ba   : > { %v4761_v34 = vpack.c.bf16 %v2642_v24, %v2642_v24  ;;  %v2768_v35 = vmax.f32 %v2442_v25, 0.0  ;;  %v2643_v36 = vmax.f32 %v1941_v26, 0.0  ;;  %v2445_v37 = vadd.f32 %v6367_v47, %v2444_v33 }
 0x1bb   : > { %v4889_v38 = vpack.c.bf16 %v2770_v29, %v2770_v29  ;;  %v4759_v39 = vpack.c.bf16 %v2640_v30, %v2640_v30  ;;  %v2771_v40 = vmax.f32 %v2453_v31, 0.0  ;;  %v2641_v41 = vmax.f32 %v1933_v32, 0.0 }
 0x1bc   : > { %3923 = vst.msk [vmem:[%s5736_s27 + $0x1a8] sm:$0xf] %vm3816_vm1, %v4761_v34  ;;  %v4887_v42 = vpack.c.bf16 %v2768_v35, %v2768_v35  ;;  %v4762_v43 = vpack.c.bf16 %v2643_v36, %v2643_v36  ;;  %v2769_v44 = vmax.f32 %v2445_v37, 0.0 }
 0x1bd   : > { %4051 = vst.msk [vmem:[%s5736_s27 + $0x3a8] sm:$0xf] %vm3816_vm1, %v4889_v38  ;;  %3921 = vst.msk [vmem:[%s5736_s27 + $0x1a0] sm:$0xf] %vm3816_vm1, %v4759_v39  ;;  %v4890_v45 = vpack.c.bf16 %v2771_v40, %v2771_v40  ;;  %v4760_v46 = vpack.c.bf16 %v2641_v41, %v2641_v41  ;;  %v5155_v9 = vpop.f32.mrb[108].mxu0 }
 0x1be   : > { %4049 = vst.msk [vmem:[%s5736_s27 + $0x3a0] sm:$0xf] %vm3816_vm1, %v4887_v42  ;;  %3924 = vst.msk [vmem:[%s5736_s27 + $0x1ac] sm:$0xf] %vm3816_vm1, %v4762_v43  ;;  %v4888_v49 = vpack.c.bf16 %v2769_v44, %v2769_v44  ;;  %v1954_v50 = vadd.f32 %v6367_v47, %v5155_v9  ;;  %v5283_v51 = vpop.f32.mrb[108].mxu1  ;;  %v1945_v52 = vpop.f32.mrb[109].mxu0 }
 0x1bf   : > { %4052 = vst.msk [vmem:[%s5736_s27 + $0x3ac] sm:$0xf] %vm3816_vm1, %v4890_v45  ;;  %3922 = vst.msk [vmem:[%s5736_s27 + $0x1a4] sm:$0xf] %vm3816_vm1, %v4760_v46  ;;  %v2466_v53 = vadd.f32 %v6367_v47, %v5283_v51  ;;  %v1946_v54 = vadd.f32 %v6367_v47, %v1945_v52  ;;  %v2457_v55 = vpop.f32.mrb[109].mxu1  ;;  %v5156_v56 = vpop.f32.mrb[110].mxu0 }
 0x1c0   : > { %4050 = vst.msk [vmem:[%s5736_s27 + $0x3a4] sm:$0xf] %vm3816_vm1, %v4888_v49  ;;  %v2646_v57 = vmax.f32 %v1954_v50, 0.0  ;;  %v2458_v58 = vadd.f32 %v6367_v47, %v2457_v55  ;;  %v1957_v59 = vadd.f32 %v6367_v47, %v5156_v56  ;;  %v5284_v60 = vpop.f32.mrb[110].mxu1  ;;  %v1948_v61 = vpop.f32.mrb[111].mxu0 }
 0x1c1   : > { %v2774_v62 = vmax.f32 %v2466_v53, 0.0  ;;  %v2644_v63 = vmax.f32 %v1946_v54, 0.0  ;;  %v2469_v0 = vadd.f32 %v6367_v47, %v5284_v60  ;;  %v1949_v1 = vadd.f32 %v6367_v47, %v1948_v61  ;;  %v2460_v2 = vpop.f32.mrb[111].mxu1 }
 0x1c2   : > { %v4765_v3 = vpack.c.bf16 %v2646_v57, %v2646_v57  ;;  %v2772_v4 = vmax.f32 %v2458_v58, 0.0  ;;  %v2647_v5 = vmax.f32 %v1957_v59, 0.0  ;;  %v2461_v6 = vadd.f32 %v6367_v47, %v2460_v2 }
 0x1c3   : > { %v4893_v7 = vpack.c.bf16 %v2774_v62, %v2774_v62  ;;  %v4763_v8 = vpack.c.bf16 %v2644_v63, %v2644_v63  ;;  %v2775_v48 = vmax.f32 %v2469_v0, 0.0  ;;  %v2645_v10 = vmax.f32 %v1949_v1, 0.0 }
 0x1c4   : > { %3927 = vst.msk [vmem:[%s5736_s27 + $0x1b8] sm:$0xf] %vm3816_vm1, %v4765_v3  ;;  %v4891_v11 = vpack.c.bf16 %v2772_v4, %v2772_v4  ;;  %v4766_v12 = vpack.c.bf16 %v2647_v5, %v2647_v5  ;;  %v2773_v13 = vmax.f32 %v2461_v6, 0.0 }
 0x1c5   : > { %4055 = vst.msk [vmem:[%s5736_s27 + $0x3b8] sm:$0xf] %vm3816_vm1, %v4893_v7  ;;  %3925 = vst.msk [vmem:[%s5736_s27 + $0x1b0] sm:$0xf] %vm3816_vm1, %v4763_v8  ;;  %v4894_v14 = vpack.c.bf16 %v2775_v48, %v2775_v48  ;;  %v4764_v15 = vpack.c.bf16 %v2645_v10, %v2645_v10  ;;  %v5159_v16 = vpop.f32.mrb[112].mxu0 }
 0x1c6   : > { %4053 = vst.msk [vmem:[%s5736_s27 + $0x3b0] sm:$0xf] %vm3816_vm1, %v4891_v11  ;;  %3928 = vst.msk [vmem:[%s5736_s27 + $0x1bc] sm:$0xf] %vm3816_vm1, %v4766_v12  ;;  %v4892_v17 = vpack.c.bf16 %v2773_v13, %v2773_v13  ;;  %v1970_v18 = vadd.f32 %v6367_v47, %v5159_v16  ;;  %v5287_v19 = vpop.f32.mrb[112].mxu1  ;;  %v1961_v20 = vpop.f32.mrb[113].mxu0 }
 0x1c7   : > { %4056 = vst.msk [vmem:[%s5736_s27 + $0x3bc] sm:$0xf] %vm3816_vm1, %v4894_v14  ;;  %3926 = vst.msk [vmem:[%s5736_s27 + $0x1b4] sm:$0xf] %vm3816_vm1, %v4764_v15  ;;  %v2482_v21 = vadd.f32 %v6367_v47, %v5287_v19  ;;  %v1962_v22 = vadd.f32 %v6367_v47, %v1961_v20  ;;  %v2473_v23 = vpop.f32.mrb[113].mxu1  ;;  %v5160_v24 = vpop.f32.mrb[114].mxu0 }
 0x1c8   : > { %4054 = vst.msk [vmem:[%s5736_s27 + $0x3b4] sm:$0xf] %vm3816_vm1, %v4892_v17  ;;  %v2650_v25 = vmax.f32 %v1970_v18, 0.0  ;;  %v2474_v26 = vadd.f32 %v6367_v47, %v2473_v23  ;;  %v1973_v27 = vadd.f32 %v6367_v47, %v5160_v24  ;;  %v5288_v28 = vpop.f32.mrb[114].mxu1  ;;  %v1964_v29 = vpop.f32.mrb[115].mxu0 }
 0x1c9   : > { %v2778_v30 = vmax.f32 %v2482_v21, 0.0  ;;  %v2648_v31 = vmax.f32 %v1962_v22, 0.0  ;;  %v2485_v32 = vadd.f32 %v6367_v47, %v5288_v28  ;;  %v1965_v33 = vadd.f32 %v6367_v47, %v1964_v29  ;;  %v2476_v34 = vpop.f32.mrb[115].mxu1 }
 0x1ca   : > { %v4769_v35 = vpack.c.bf16 %v2650_v25, %v2650_v25  ;;  %v2776_v36 = vmax.f32 %v2474_v26, 0.0  ;;  %v2651_v37 = vmax.f32 %v1973_v27, 0.0  ;;  %v2477_v38 = vadd.f32 %v6367_v47, %v2476_v34 }
 0x1cb   : > { %v4897_v39 = vpack.c.bf16 %v2778_v30, %v2778_v30  ;;  %v4767_v40 = vpack.c.bf16 %v2648_v31, %v2648_v31  ;;  %v2779_v41 = vmax.f32 %v2485_v32, 0.0  ;;  %v2649_v42 = vmax.f32 %v1965_v33, 0.0 }
 0x1cc   : > { %3931 = vst.msk [vmem:[%s5736_s27 + $0x1c8] sm:$0xf] %vm3816_vm1, %v4769_v35  ;;  %v4895_v43 = vpack.c.bf16 %v2776_v36, %v2776_v36  ;;  %v4770_v44 = vpack.c.bf16 %v2651_v37, %v2651_v37  ;;  %v2777_v45 = vmax.f32 %v2477_v38, 0.0 }
 0x1cd   : > { %4059 = vst.msk [vmem:[%s5736_s27 + $0x3c8] sm:$0xf] %vm3816_vm1, %v4897_v39  ;;  %3929 = vst.msk [vmem:[%s5736_s27 + $0x1c0] sm:$0xf] %vm3816_vm1, %v4767_v40  ;;  %v4898_v46 = vpack.c.bf16 %v2779_v41, %v2779_v41  ;;  %v4768_v9 = vpack.c.bf16 %v2649_v42, %v2649_v42  ;;  %v5163_v49 = vpop.f32.mrb[116].mxu0 }
 0x1ce   : > { %4057 = vst.msk [vmem:[%s5736_s27 + $0x3c0] sm:$0xf] %vm3816_vm1, %v4895_v43  ;;  %3932 = vst.msk [vmem:[%s5736_s27 + $0x1cc] sm:$0xf] %vm3816_vm1, %v4770_v44  ;;  %v4896_v50 = vpack.c.bf16 %v2777_v45, %v2777_v45  ;;  %v1986_v51 = vadd.f32 %v6367_v47, %v5163_v49  ;;  %v5291_v52 = vpop.f32.mrb[116].mxu1  ;;  %v1977_v53 = vpop.f32.mrb[117].mxu0 }
 0x1cf   : > { %4060 = vst.msk [vmem:[%s5736_s27 + $0x3cc] sm:$0xf] %vm3816_vm1, %v4898_v46  ;;  %3930 = vst.msk [vmem:[%s5736_s27 + $0x1c4] sm:$0xf] %vm3816_vm1, %v4768_v9  ;;  %v2498_v54 = vadd.f32 %v6367_v47, %v5291_v52  ;;  %v1978_v55 = vadd.f32 %v6367_v47, %v1977_v53  ;;  %v2489_v56 = vpop.f32.mrb[117].mxu1  ;;  %v5164_v57 = vpop.f32.mrb[118].mxu0 }
 0x1d0   : > { %4058 = vst.msk [vmem:[%s5736_s27 + $0x3c4] sm:$0xf] %vm3816_vm1, %v4896_v50  ;;  %v2654_v58 = vmax.f32 %v1986_v51, 0.0  ;;  %v2490_v59 = vadd.f32 %v6367_v47, %v2489_v56  ;;  %v1989_v60 = vadd.f32 %v6367_v47, %v5164_v57  ;;  %v5292_v61 = vpop.f32.mrb[118].mxu1  ;;  %v1980_v62 = vpop.f32.mrb[119].mxu0 }
 0x1d1   : > { %v2782_v63 = vmax.f32 %v2498_v54, 0.0  ;;  %v2652_v0 = vmax.f32 %v1978_v55, 0.0  ;;  %v2501_v1 = vadd.f32 %v6367_v47, %v5292_v61  ;;  %v1981_v2 = vadd.f32 %v6367_v47, %v1980_v62  ;;  %v2492_v3 = vpop.f32.mrb[119].mxu1 }
 0x1d2   : > { %v4773_v4 = vpack.c.bf16 %v2654_v58, %v2654_v58  ;;  %v2780_v5 = vmax.f32 %v2490_v59, 0.0  ;;  %v2655_v6 = vmax.f32 %v1989_v60, 0.0  ;;  %v2493_v7 = vadd.f32 %v6367_v47, %v2492_v3 }
 0x1d3   : > { %v4901_v8 = vpack.c.bf16 %v2782_v63, %v2782_v63  ;;  %v4771_v48 = vpack.c.bf16 %v2652_v0, %v2652_v0  ;;  %v2783_v10 = vmax.f32 %v2501_v1, 0.0  ;;  %v2653_v11 = vmax.f32 %v1981_v2, 0.0 }
 0x1d4   : > { %3935 = vst.msk [vmem:[%s5736_s27 + $0x1d8] sm:$0xf] %vm3816_vm1, %v4773_v4  ;;  %v4899_v12 = vpack.c.bf16 %v2780_v5, %v2780_v5  ;;  %v4774_v13 = vpack.c.bf16 %v2655_v6, %v2655_v6  ;;  %v2781_v14 = vmax.f32 %v2493_v7, 0.0 }
 0x1d5   : > { %4063 = vst.msk [vmem:[%s5736_s27 + $0x3d8] sm:$0xf] %vm3816_vm1, %v4901_v8  ;;  %3933 = vst.msk [vmem:[%s5736_s27 + $0x1d0] sm:$0xf] %vm3816_vm1, %v4771_v48  ;;  %v4902_v15 = vpack.c.bf16 %v2783_v10, %v2783_v10  ;;  %v4772_v16 = vpack.c.bf16 %v2653_v11, %v2653_v11  ;;  %v5167_v17 = vpop.f32.mrb[120].mxu0 }
 0x1d6   : > { %4061 = vst.msk [vmem:[%s5736_s27 + $0x3d0] sm:$0xf] %vm3816_vm1, %v4899_v12  ;;  %3936 = vst.msk [vmem:[%s5736_s27 + $0x1dc] sm:$0xf] %vm3816_vm1, %v4774_v13  ;;  %v4900_v18 = vpack.c.bf16 %v2781_v14, %v2781_v14  ;;  %v2002_v19 = vadd.f32 %v6367_v47, %v5167_v17  ;;  %v5295_v20 = vpop.f32.mrb[120].mxu1  ;;  %v1993_v21 = vpop.f32.mrb[121].mxu0 }
 0x1d7   : > { %4064 = vst.msk [vmem:[%s5736_s27 + $0x3dc] sm:$0xf] %vm3816_vm1, %v4902_v15  ;;  %3934 = vst.msk [vmem:[%s5736_s27 + $0x1d4] sm:$0xf] %vm3816_vm1, %v4772_v16  ;;  %v2514_v22 = vadd.f32 %v6367_v47, %v5295_v20  ;;  %v1994_v23 = vadd.f32 %v6367_v47, %v1993_v21  ;;  %v2505_v24 = vpop.f32.mrb[121].mxu1  ;;  %v5168_v25 = vpop.f32.mrb[122].mxu0 }
 0x1d8   : > { %4062 = vst.msk [vmem:[%s5736_s27 + $0x3d4] sm:$0xf] %vm3816_vm1, %v4900_v18  ;;  %v2658_v26 = vmax.f32 %v2002_v19, 0.0  ;;  %v2506_v27 = vadd.f32 %v6367_v47, %v2505_v24  ;;  %v2005_v28 = vadd.f32 %v6367_v47, %v5168_v25  ;;  %v5296_v29 = vpop.f32.mrb[122].mxu1  ;;  %v1996_v30 = vpop.f32.mrb[123].mxu0 }
 0x1d9   : > { %v2786_v31 = vmax.f32 %v2514_v22, 0.0  ;;  %v2656_v32 = vmax.f32 %v1994_v23, 0.0  ;;  %v2517_v33 = vadd.f32 %v6367_v47, %v5296_v29  ;;  %v1997_v34 = vadd.f32 %v6367_v47, %v1996_v30  ;;  %v2508_v35 = vpop.f32.mrb[123].mxu1 }
 0x1da   : > { %v4777_v36 = vpack.c.bf16 %v2658_v26, %v2658_v26  ;;  %v2784_v37 = vmax.f32 %v2506_v27, 0.0  ;;  %v2659_v38 = vmax.f32 %v2005_v28, 0.0  ;;  %v2509_v39 = vadd.f32 %v6367_v47, %v2508_v35 }
 0x1db   : > { %v4905_v40 = vpack.c.bf16 %v2786_v31, %v2786_v31  ;;  %v4775_v41 = vpack.c.bf16 %v2656_v32, %v2656_v32  ;;  %v2787_v42 = vmax.f32 %v2517_v33, 0.0  ;;  %v2657_v43 = vmax.f32 %v1997_v34, 0.0 }
 0x1dc   : > { %3939 = vst.msk [vmem:[%s5736_s27 + $0x1e8] sm:$0xf] %vm3816_vm1, %v4777_v36  ;;  %v4903_v44 = vpack.c.bf16 %v2784_v37, %v2784_v37  ;;  %v4778_v45 = vpack.c.bf16 %v2659_v38, %v2659_v38  ;;  %v2785_v46 = vmax.f32 %v2509_v39, 0.0 }
 0x1dd   : > { %4067 = vst.msk [vmem:[%s5736_s27 + $0x3e8] sm:$0xf] %vm3816_vm1, %v4905_v40  ;;  %3937 = vst.msk [vmem:[%s5736_s27 + $0x1e0] sm:$0xf] %vm3816_vm1, %v4775_v41  ;;  %v4906_v9 = vpack.c.bf16 %v2787_v42, %v2787_v42  ;;  %v4776_v49 = vpack.c.bf16 %v2657_v43, %v2657_v43  ;;  %v5171_v50 = vpop.f32.mrb[124].mxu0 }
 0x1de   : > { %4065 = vst.msk [vmem:[%s5736_s27 + $0x3e0] sm:$0xf] %vm3816_vm1, %v4903_v44  ;;  %3940 = vst.msk [vmem:[%s5736_s27 + $0x1ec] sm:$0xf] %vm3816_vm1, %v4778_v45  ;;  %v4904_v51 = vpack.c.bf16 %v2785_v46, %v2785_v46  ;;  %v2018_v52 = vadd.f32 %v6367_v47, %v5171_v50  ;;  %v5299_v53 = vpop.f32.mrb[124].mxu1  ;;  %v2009_v54 = vpop.f32.mrb[125].mxu0 }
 0x1df   : > { %4068 = vst.msk [vmem:[%s5736_s27 + $0x3ec] sm:$0xf] %vm3816_vm1, %v4906_v9  ;;  %3938 = vst.msk [vmem:[%s5736_s27 + $0x1e4] sm:$0xf] %vm3816_vm1, %v4776_v49  ;;  %v2530_v55 = vadd.f32 %v6367_v47, %v5299_v53  ;;  %v2010_v56 = vadd.f32 %v6367_v47, %v2009_v54  ;;  %v2521_v57 = vpop.f32.mrb[125].mxu1  ;;  %v5172_v58 = vpop.f32.mrb[126].mxu0 }
 0x1e0   : > { %4066 = vst.msk [vmem:[%s5736_s27 + $0x3e4] sm:$0xf] %vm3816_vm1, %v4904_v51  ;;  %v2662_v59 = vmax.f32 %v2018_v52, 0.0  ;;  %v2522_v60 = vadd.f32 %v6367_v47, %v2521_v57  ;;  %v2021_v61 = vadd.f32 %v6367_v47, %v5172_v58  ;;  %v5300_v62 = vpop.f32.mrb[126].mxu1  ;;  %v2012_v63 = vpop.f32.mrb[127].mxu0 }
 0x1e1   : > { %v2790_v0 = vmax.f32 %v2530_v55, 0.0  ;;  %v2660_v1 = vmax.f32 %v2010_v56, 0.0  ;;  %v2533_v2 = vadd.f32 %v6367_v47, %v5300_v62  ;;  %v2013_v3 = vadd.f32 %v6367_v47, %v2012_v63  ;;  %v2524_v4 = vpop.f32.mrb[127].mxu1 }
 0x1e2   : > { %v4781_v5 = vpack.c.bf16 %v2662_v59, %v2662_v59  ;;  %v2788_v6 = vmax.f32 %v2522_v60, 0.0  ;;  %v2663_v7 = vmax.f32 %v2021_v61, 0.0  ;;  %v2525_v8 = vadd.f32 %v6367_v47, %v2524_v4 }
 0x1e3   : > { %v4909_v48 = vpack.c.bf16 %v2790_v0, %v2790_v0  ;;  %v4779_v10 = vpack.c.bf16 %v2660_v1, %v2660_v1  ;;  %v2791_v11 = vmax.f32 %v2533_v2, 0.0  ;;  %v2661_v12 = vmax.f32 %v2013_v3, 0.0 }
 0x1e4   : > { %3943 = vst.msk [vmem:[%s5736_s27 + $0x1f8] sm:$0xf] %vm3816_vm1, %v4781_v5  ;;  %v4907_v13 = vpack.c.bf16 %v2788_v6, %v2788_v6  ;;  %v4782_v14 = vpack.c.bf16 %v2663_v7, %v2663_v7  ;;  %v2789_v15 = vmax.f32 %v2525_v8, 0.0 }
 0x1e5   : > { %4071 = vst.msk [vmem:[%s5736_s27 + $0x3f8] sm:$0xf] %vm3816_vm1, %v4909_v48  ;;  %3941 = vst.msk [vmem:[%s5736_s27 + $0x1f0] sm:$0xf] %vm3816_vm1, %v4779_v10  ;;  %v4910_v16 = vpack.c.bf16 %v2791_v11, %v2791_v11  ;;  %v4780_v17 = vpack.c.bf16 %v2661_v12, %v2661_v12 }
 0x1e6   : > { %4069 = vst.msk [vmem:[%s5736_s27 + $0x3f0] sm:$0xf] %vm3816_vm1, %v4907_v13  ;;  %3944 = vst.msk [vmem:[%s5736_s27 + $0x1fc] sm:$0xf] %vm3816_vm1, %v4782_v14  ;;  %v4908_v47 = vpack.c.bf16 %v2789_v15, %v2789_v15 }
 0x1e7   : > { %4072 = vst.msk [vmem:[%s5736_s27 + $0x3fc] sm:$0xf] %vm3816_vm1, %v4910_v16  ;;  %3942 = vst.msk [vmem:[%s5736_s27 + $0x1f4] sm:$0xf] %vm3816_vm1, %v4780_v17 }
 0x1e8   : > { %4070 = vst.msk [vmem:[%s5736_s27 + $0x3f4] sm:$0xf] %vm3816_vm1, %v4908_v47 }
 0x1e9 PF: > { %s13_s12 = sadd.s32 1, %s5451_s12  }
 0x1ea   : > { %p10_p4 = scmp.ge.s32.totalorder %s13_s12, 10  }
 0x1ec   :  { %12 = sbr.rel (!%p10_p4) target bundleno = 1 (0x1), region = 62 }

</bundles_post_ra>
